<compile_context>
chip_gen: v5e
topology: v5e:2x2
jax: 0.10.0
libtpu: 0.0.40
codegen_flags: <defaults>
</compile_context>

<pallas_src>
import functools

import jax
import jax.numpy as jnp
from jax.experimental import pallas as pl
from jax.experimental.pallas import tpu as pltpu

# ----------------------- module hyper-parameters (synthetic) -----------------
IN_CHANNELS = 32
GROWTH_RATE = 16
PATH = 2
BOTTLENECK = 4
GROUP_1x1 = 2
GROUP_3x3 = 2
GROUP_TRANS = 2

CIN_P = IN_CHANNELS // PATH                 # in_channels / path           = 16
CB_P = BOTTLENECK * GROWTH_RATE // PATH     # bottleneck*growth_rate/path  = 32
CG_P = GROWTH_RATE // PATH                  # growth_rate / path           = 8
BN_EPS = 1e-5

_PAD = 128                                  # lane-aligned border (>= W+1)


# --------------------------------- Pallas kernel -----------------------------
def _fused_kernel(x_ref, s1_ref, b1_ref, w1_ref, b2_ref, w2_ref,
                  s3_ref, b3_ref, w3m_ref, o_ref, tap_ref, *, H, W):
    """Both dense-layer paths for one batch element, channels-first (C, HW)."""
    HW = H * W
    cg_t = w3m_ref.shape[1]         # total growth channels (both paths)     = 16
    cin = x_ref.shape[1]            # total input channels                   = 32
    cin_p = cin // 2                # per-path input channels                = 16
    cg_p = cg_t // 2                # per-path growth channels               = 8

    x = x_ref[0]                                                   # (Cin, HW)

    # ---- CondenseLGC (index_select, ShuffleLayer and BN2-scale folded in) ---
    h1 = jnp.maximum(x * s1_ref[...] + b1_ref[...], 0.0)
    h2 = jnp.maximum(
        jnp.dot(w1_ref[...], h1, preferred_element_type=jnp.float32)
        + b2_ref[...], 0.0)                                        # (cb_t, HW)

    # ---- Conv: 3x3 group conv (pad=1) as one stacked matmul + shifted taps --
    # taps[t*cg:(t+1)*cg, q] = W2_tap_t @ h2 evaluated at input pixel q.
    tap_ref[:, _PAD:_PAD + HW] = jnp.dot(
        w2_ref[...], h2, preferred_element_type=jnp.float32)       # (9*cg_t, HW)

    pos = jax.lax.broadcasted_iota(jnp.int32, (1, HW), 1)
    col_x = pos % W
    m_l = col_x >= 1                 # tap dx = -1 needs x-1 >= 0
    m_r = col_x <= W - 2             # tap dx = +1 needs x+1 <  W
    m_u = pos >= W                   # tap dy = -1 needs y-1 >= 0
    m_d = pos < (H - 1) * W          # tap dy = +1 needs y+1 <  H

    acc = jnp.zeros((cg_t, HW), jnp.float32)
    t = 0
    for dy in (-1, 0, 1):
        for dx in (-1, 0, 1):
            off = _PAD + dy * W + dx
            u = tap_ref[t * cg_t:(t + 1) * cg_t, off:off + HW]     # (cg_t, HW)
            mask = None
            if dy == -1:
                mask = m_u
            elif dy == 1:
                mask = m_d
            if dx == -1:
                mask = m_l if mask is None else jnp.logical_and(mask, m_l)
            elif dx == 1:
                mask = m_r if mask is None else jnp.logical_and(mask, m_r)
            if mask is not None:
                u = jnp.where(mask, u, 0.0)
            acc = acc + u
            t += 1

    # ---- CondenseSFR (ShuffleLayerTrans + 1x1 conv + @M folded into w3m) ----
    g = jnp.maximum(acc * s3_ref[...] + b3_ref[...], 0.0)
    in_part = x + jnp.dot(w3m_ref[...], g, preferred_element_type=jnp.float32)

    # ---- fused concat([in_1, out_2, in_2, out_1]) along channels ------------
    o_ref[0, 0:cin_p, :] = in_part[0:cin_p].astype(o_ref.dtype)
    o_ref[0, cin_p:cin_p + cg_p, :] = acc[cg_p:2 * cg_p].astype(o_ref.dtype)
    o_ref[0, cin_p + cg_p:2 * cin_p + cg_p, :] = \
        in_part[cin_p:2 * cin_p].astype(o_ref.dtype)
    o_ref[0, 2 * cin_p + cg_p:2 * cin_p + 2 * cg_p, :] = \
        acc[0:cg_p].astype(o_ref.dtype)


def _run_fused(x, fp, H, W):
    N, c_in, HW = x.shape
    cb_t = fp["w1"].shape[0]
    cg_t = fp["w3m"].shape[1]
    c_out = c_in + cg_t
    kern = functools.partial(_fused_kernel, H=H, W=W)
    fix2 = lambda n: (0, 0)
    return pl.pallas_call(
        kern,
        out_shape=jax.ShapeDtypeStruct((N, c_out, HW), jnp.float32),
        grid_spec=pltpu.PrefetchScalarGridSpec(
            num_scalar_prefetch=0,
            grid=(N,),
            in_specs=[
                pl.BlockSpec((1, c_in, HW), lambda n: (n, 0, 0)),   # x (NCHW slab)
                pl.BlockSpec((c_in, 1), fix2),                      # s1
                pl.BlockSpec((c_in, 1), fix2),                      # b1
                pl.BlockSpec((cb_t, c_in), fix2),                   # w1 (block-diag, bn2 scale folded)
                pl.BlockSpec((cb_t, 1), fix2),                      # b2
                pl.BlockSpec((9 * cg_t, cb_t), fix2),               # w2 taps (stacked)
                pl.BlockSpec((cg_t, 1), fix2),                      # s3
                pl.BlockSpec((cg_t, 1), fix2),                      # b3
                pl.BlockSpec((c_in, cg_t), fix2),                   # w3m = M^T @ w3
            ],
            out_specs=pl.BlockSpec((1, c_out, HW), lambda n: (n, 0, 0)),
            scratch_shapes=[pltpu.VMEM((9 * cg_t, 2 * _PAD + HW), jnp.float32)],
        ),
        compiler_params=pltpu.CompilerParams(
            dimension_semantics=("parallel",)),
    )(x, fp["s1"], fp["b1"], fp["w1"], fp["b2"], fp["w2"],
      fp["s3"], fp["b3"], fp["w3m"])


# ------------------------- parameter setup (plain JAX glue) ------------------
def _fold_bn(bn):
    scale = bn["gamma"] / jnp.sqrt(bn["var"] + BN_EPS)
    bias = bn["beta"] - bn["mean"] * scale
    return scale, bias


def _dense_1x1_left(weight, groups):
    # torch weight (Cout, Cin//g, 1, 1) -> dense (Cout, Cin) for W @ x_cf
    cout, cin_g = weight.shape[0], weight.shape[1]
    cin, cout_g = cin_g * groups, cout // groups
    w = jnp.zeros((cout, cin), jnp.float32)
    for g in range(groups):
        w = w.at[g * cout_g:(g + 1) * cout_g,
                 g * cin_g:(g + 1) * cin_g].set(
            weight[g * cout_g:(g + 1) * cout_g, :, 0, 0])
    return w


def _dense_3x3_left(weight, groups):
    # torch weight (Cout, Cin//g, 3, 3) -> dense (9, Cout, Cin), tap = ky*3+kx
    cout, cin_g = weight.shape[0], weight.shape[1]
    cin, cout_g = cin_g * groups, cout // groups
    w = jnp.zeros((3, 3, cout, cin), jnp.float32)
    for g in range(groups):
        blk = jnp.transpose(weight[g * cout_g:(g + 1) * cout_g], (2, 3, 0, 1))
        w = w.at[:, :, g * cout_g:(g + 1) * cout_g,
                 g * cin_g:(g + 1) * cin_g].set(blk)
    return w.reshape(9, cout, cin)


def _shuffle_perm(c, groups):          # ShuffleLayer: out[k] = in[perm[k]]
    k = jnp.arange(c)
    return (k % groups) * (c // groups) + (k // groups)


def _shuffle_trans_perm(c, groups):    # ShuffleLayerTrans: out[k] = in[perm[k]]
    k = jnp.arange(c)
    return (k % (c // groups)) * groups + (k // (c // groups))


def _block_diag(mats):
    rows = sum(m.shape[0] for m in mats)
    cols = sum(m.shape[1] for m in mats)
    out = jnp.zeros((rows, cols), jnp.float32)
    r = c = 0
    for m in mats:
        out = out.at[r:r + m.shape[0], c:c + m.shape[1]].set(m)
        r += m.shape[0]
        c += m.shape[1]
    return out


def build_fused_params(raws):
    s1l, b1l, w1l = [], [], []
    s2l, b2l, w2l = [], [], []
    s3l, b3l, w3ml = [], [], []
    for r in raws:
        s1, b1 = _fold_bn(r["bn1"])
        s2, b2 = _fold_bn(r["bn2"])
        s3, b3 = _fold_bn(r["bn3"])
        # fold index_select into columns (inverse perm) and ShuffleLayer into rows.
        inv1 = jnp.argsort(r["index1"])
        w1 = _dense_1x1_left(r["w1"], GROUP_1x1)
        w1 = w1[_shuffle_perm(CB_P, GROUP_1x1), :][:, inv1]
        s1l.append(s1[inv1]); b1l.append(b1[inv1]); w1l.append(w1)
        s2l.append(s2); b2l.append(b2)
        w2l.append(_dense_3x3_left(r["w2"], GROUP_3x3))        # (9, cg, cb)
        s3l.append(s3); b3l.append(b3)
        # fold ShuffleLayerTrans into columns of w3, then pre-multiply by M^T.
        w3 = _dense_1x1_left(r["w3"], GROUP_TRANS)
        w3 = w3[:, jnp.argsort(_shuffle_trans_perm(CG_P, GROUP_TRANS))]
        w3ml.append(jnp.matmul(r["M"].T, w3,
                               precision=jax.lax.Precision.HIGHEST))

    col = lambda xs: jnp.concatenate(xs).reshape(-1, 1)
    w1 = _block_diag(w1l)                                      # (cb_t, cin_t)
    w1 = col(s2l) * w1                                         # fold BN2 scale
    w2 = jnp.stack([_block_diag([w[t] for w in w2l]) for t in range(9)])
    w2 = w2.reshape(9 * w2.shape[1], w2.shape[2])              # (9*cg_t, cb_t)
    w3m = _block_diag(w3ml)                                    # (cin_t, cg_t)
    return dict(s1=col(s1l), b1=col(b1l), w1=w1,
                b2=col(b2l), w2=w2,
                s3=col(s3l), b3=col(b3l), w3m=w3m)


def init_raw_params(key):
    def bn(k, c):
        k1, k2, k3, k4 = jax.random.split(k, 4)
        return dict(gamma=jax.random.uniform(k1, (c,), minval=0.5, maxval=1.5),
                    beta=0.1 * jax.random.normal(k2, (c,)),
                    mean=0.1 * jax.random.normal(k3, (c,)),
                    var=jax.random.uniform(k4, (c,), minval=0.5, maxval=1.5))

    raws = []
    for p in range(PATH):
        ks = jax.random.split(jax.random.fold_in(key, p), 8)
        raws.append(dict(
            index1=jax.random.permutation(ks[0], CIN_P),
            bn1=bn(ks[1], CIN_P),
            w1=0.2 * jax.random.normal(ks[2], (CB_P, CIN_P // GROUP_1x1, 1, 1)),
            bn2=bn(ks[3], CB_P),
            w2=0.2 * jax.random.normal(ks[4], (CG_P, CB_P // GROUP_3x3, 3, 3)),
            bn3=bn(ks[5], CG_P),
            w3=0.2 * jax.random.normal(ks[6], (CIN_P, CG_P // GROUP_TRANS, 1, 1)),
            M=0.2 * jax.random.normal(ks[7], (CIN_P, CIN_P)),
        ))
    return raws


# --------------------------- Pallas-backed forward ---------------------------
def pallas_forward(x_nchw, raws):
    N, C, H, W = x_nchw.shape
    fp = build_fused_params(raws)
    x = x_nchw.reshape(N, C, H * W)                 # channels-first, no transpose
    out = _run_fused(x, fp, H, W)                   # (N, C + growth_rate, H*W)
    return out.reshape(N, C + GROWTH_RATE, H, W)    # already NCHW


# ------------------------ pure-JAX reference (NCHW) --------------------------
def _bn_ref(x, p):
    scale = p["gamma"] / jnp.sqrt(p["var"] + BN_EPS)
    bias = p["beta"] - p["mean"] * scale
    return x * scale[None, :, None, None] + bias[None, :, None, None]


def _conv_ref(x, w, groups, padding):
    return jax.lax.conv_general_dilated(
        x, w, (1, 1), ((padding, padding), (padding, padding)),
        dimension_numbers=("NCHW", "OIHW", "NCHW"),
        feature_group_count=groups, precision=jax.lax.Precision.HIGHEST)


def _shuffle_ref(x, groups):
    n, c, h, w = x.shape
    return jnp.transpose(x.reshape(n, groups, c // groups, h, w),
                         (0, 2, 1, 3, 4)).reshape(n, c, h, w)


def _shuffle_trans_ref(x, groups):
    n, c, h, w = x.shape
    return jnp.transpose(x.reshape(n, c // groups, groups, h, w),
                         (0, 2, 1, 3, 4)).reshape(n, c, h, w)


def reference_forward(x, raws):
    parts_in, parts_out = [], []
    for p in range(PATH):
        r = raws[p]
        xp = x[:, p * CIN_P:(p + 1) * CIN_P]
        h = xp[:, r["index1"]]
        h = jnp.maximum(_bn_ref(h, r["bn1"]), 0.0)
        h = _conv_ref(h, r["w1"], GROUP_1x1, 0)
        h = _shuffle_ref(h, GROUP_1x1)
        h = jnp.maximum(_bn_ref(h, r["bn2"]), 0.0)
        h = _conv_ref(h, r["w2"], GROUP_3x3, 1)
        out_p = h
        g = jnp.maximum(_bn_ref(h, r["bn3"]), 0.0)
        g = _shuffle_trans_ref(g, GROUP_TRANS)
        g = _conv_ref(g, r["w3"], GROUP_TRANS, 0)
        n, c, hh, ww = g.shape
        g = jnp.transpose(g.reshape(n, c, hh * ww), (0, 2, 1))
        g = jnp.einsum("nsc,cd->nsd", g, r["M"],
                       precision=jax.lax.Precision.HIGHEST)
        g = jnp.transpose(g, (0, 2, 1)).reshape(n, c, hh, ww)
        parts_in.append(xp + g)
        parts_out.append(out_p)
    ret = []
    for i in range(PATH):
        if i % 2 == 0:
            ret += [parts_in[i], parts_out[i + 1], parts_in[i + 1], parts_out[i]]
    return jnp.concatenate(ret, axis=1)


# ------------------------------------ main ------------------------------------
if __name__ == "__main__":
    key = jax.random.PRNGKey(0)
    kx, kparam = jax.random.split(key)
    x = jax.random.normal(kx, (2, IN_CHANNELS, 16, 16), jnp.float32)  # NCHW
    raws = init_raw_params(kparam)

    y = pallas_forward(x, raws)
    y = jax.block_until_ready(y)

    assert y.shape == (2, IN_CHANNELS + GROWTH_RATE, 16, 16), y.shape
    y_ref = reference_forward(x, raws)
    max_err = float(jnp.max(jnp.abs(y - y_ref)))
    if not bool(jnp.allclose(y, y_ref, rtol=5e-3, atol=5e-3)):
        raise AssertionError(f"Pallas result mismatch, max abs err = {max_err}")
    print("KERNEL_OK")
</pallas_src>

<mosaic_0001>
module attributes {stable_mosaic.version = 11 : i64} {
  func.func @_fused_kernel(%arg0: i32, %arg1: memref<1x32x256xf32, #tpu.memory_space<vmem>>, %arg2: memref<32x1xf32, #tpu.memory_space<vmem>>, %arg3: memref<32x1xf32, #tpu.memory_space<vmem>>, %arg4: memref<64x32xf32, #tpu.memory_space<vmem>>, %arg5: memref<64x1xf32, #tpu.memory_space<vmem>>, %arg6: memref<144x64xf32, #tpu.memory_space<vmem>>, %arg7: memref<16x1xf32, #tpu.memory_space<vmem>>, %arg8: memref<16x1xf32, #tpu.memory_space<vmem>>, %arg9: memref<32x16xf32, #tpu.memory_space<vmem>>, %arg10: memref<1x48x256xf32, #tpu.memory_space<vmem>>, %arg11: memref<144x512xf32, #tpu.memory_space<vmem>>) attributes {dimension_semantics = [#tpu.dimension_semantics<parallel>], iteration_bounds = array<i64: 2>, scalar_prefetch = 0 : i64, scratch_operands = 1 : i64, tpu.core_type = #tpu.core_type<tc>, window_params = [{transform_indices = @transform_0, window_bounds = array<i64: 1, 32, 256>}, {pipeline_mode = #tpu.pipeline_mode<synchronous>, transform_indices = @transform_1, window_bounds = array<i64: 32, 1>}, {pipeline_mode = #tpu.pipeline_mode<synchronous>, transform_indices = @transform_2, window_bounds = array<i64: 32, 1>}, {pipeline_mode = #tpu.pipeline_mode<synchronous>, transform_indices = @transform_3, window_bounds = array<i64: 64, 32>}, {pipeline_mode = #tpu.pipeline_mode<synchronous>, transform_indices = @transform_4, window_bounds = array<i64: 64, 1>}, {pipeline_mode = #tpu.pipeline_mode<synchronous>, transform_indices = @transform_5, window_bounds = array<i64: 144, 64>}, {pipeline_mode = #tpu.pipeline_mode<synchronous>, transform_indices = @transform_6, window_bounds = array<i64: 16, 1>}, {pipeline_mode = #tpu.pipeline_mode<synchronous>, transform_indices = @transform_7, window_bounds = array<i64: 16, 1>}, {pipeline_mode = #tpu.pipeline_mode<synchronous>, transform_indices = @transform_8, window_bounds = array<i64: 32, 16>}, {transform_indices = @transform_9, window_bounds = array<i64: 1, 48, 256>}]} {
    %c0 = arith.constant 0 : index
    %c0_0 = arith.constant 0 : index
    %c0_1 = arith.constant 0 : index
    %0 = vector.load %arg1[%c0, %c0_0, %c0_1] : memref<1x32x256xf32, #tpu.memory_space<vmem>>, vector<1x32x256xf32>
    %1 = vector.shape_cast %0 : vector<1x32x256xf32> to vector<32x256xf32>
    %c0_2 = arith.constant 0 : index
    %c0_3 = arith.constant 0 : index
    %2 = vector.load %arg2[%c0_2, %c0_3] : memref<32x1xf32, #tpu.memory_space<vmem>>, vector<32x1xf32>
    %3 = vector.broadcast %2 : vector<32x1xf32> to vector<32x256xf32>
    %4 = arith.mulf %1, %3 : vector<32x256xf32>
    %c0_4 = arith.constant 0 : index
    %c0_5 = arith.constant 0 : index
    %5 = vector.load %arg3[%c0_4, %c0_5] : memref<32x1xf32, #tpu.memory_space<vmem>>, vector<32x1xf32>
    %6 = vector.broadcast %5 : vector<32x1xf32> to vector<32x256xf32>
    %7 = arith.addf %4, %6 : vector<32x256xf32>
    %cst = arith.constant 0.000000e+00 : f32
    %8 = vector.broadcast %cst : f32 to vector<32x256xf32>
    %9 = arith.maximumf %7, %8 : vector<32x256xf32>
    %c0_6 = arith.constant 0 : index
    %c0_7 = arith.constant 0 : index
    %10 = vector.load %arg4[%c0_6, %c0_7] : memref<64x32xf32, #tpu.memory_space<vmem>>, vector<64x32xf32>
    %cst_8 = arith.constant dense<0.000000e+00> : vector<64x256xf32>
    %11 = tpu.matmul %10, %9, %cst_8 {dimension_numbers = #tpu.dot_dimension_numbers<[1], [0], [0], [1], [0, 0, 1, 1], [], []>} : vector<64x32xf32>, vector<32x256xf32>, vector<64x256xf32> -> vector<64x256xf32>
    %c0_9 = arith.constant 0 : index
    %c0_10 = arith.constant 0 : index
    %12 = vector.load %arg5[%c0_9, %c0_10] : memref<64x1xf32, #tpu.memory_space<vmem>>, vector<64x1xf32>
    %13 = vector.broadcast %12 : vector<64x1xf32> to vector<64x256xf32>
    %14 = arith.addf %11, %13 : vector<64x256xf32>
    %cst_11 = arith.constant 0.000000e+00 : f32
    %15 = vector.broadcast %cst_11 : f32 to vector<64x256xf32>
    %16 = arith.maximumf %14, %15 : vector<64x256xf32>
    %c0_12 = arith.constant 0 : index
    %c0_13 = arith.constant 0 : index
    %17 = vector.load %arg6[%c0_12, %c0_13] : memref<144x64xf32, #tpu.memory_space<vmem>>, vector<144x64xf32>
    %cst_14 = arith.constant dense<0.000000e+00> : vector<144x256xf32>
    %18 = tpu.matmul %17, %16, %cst_14 {dimension_numbers = #tpu.dot_dimension_numbers<[1], [0], [0], [1], [0, 0, 1, 1], [], []>} : vector<144x64xf32>, vector<64x256xf32>, vector<144x256xf32> -> vector<144x256xf32>
    %c0_15 = arith.constant 0 : index
    %c128 = arith.constant 128 : index
    %19 = vector.load %arg11[%c0_15, %c128] : memref<144x512xf32, #tpu.memory_space<vmem>>, vector<144x256xf32>
    tpu.vector_store %arg11[%c0_15, %c128], %18 {strides = array<i32>} : memref<144x512xf32, #tpu.memory_space<vmem>>, vector<144x256xf32>,
    %20 = tpu.iota {dimensions = array<i32: 1>} : vector<1x256xi32>
    %c16_i32 = arith.constant 16 : i32
    %c0_i32 = arith.constant 0 : i32
    %21 = arith.cmpi eq, %c16_i32, %c0_i32 : i32
    %c1_i32 = arith.constant 1 : i32
    %22 = arith.select %21, %c1_i32, %c16_i32 : i32
    %23 = vector.broadcast %22 : i32 to vector<1x256xi32>
    %24 = arith.remsi %20, %23 : vector<1x256xi32>
    %c0_i32_16 = arith.constant 0 : i32
    %25 = vector.broadcast %c0_i32_16 : i32 to vector<1x256xi32>
    %26 = arith.cmpi ne, %24, %25 : vector<1x256xi32>
    %c0_i32_17 = arith.constant 0 : i32
    %27 = vector.broadcast %c0_i32_17 : i32 to vector<1x256xi32>
    %28 = arith.cmpi slt, %24, %27 : vector<1x256xi32>
    %c0_i32_18 = arith.constant 0 : i32
    %29 = arith.cmpi slt, %22, %c0_i32_18 : i32
    %30 = vector.broadcast %29 : i1 to vector<1x256xi1>
    %31 = vector.broadcast %30 : vector<1x256xi1> to vector<1x256xi1>
    %32 = arith.xori %28, %31 : vector<1x256xi1>
    %33 = arith.andi %32, %26 : vector<1x256xi1>
    %34 = vector.broadcast %22 : i32 to vector<1x256xi32>
    %35 = arith.addi %24, %34 : vector<1x256xi32>
    %36 = arith.select %33, %35, %24 : vector<1x256xi1>, vector<1x256xi32>
    %c1_i32_19 = arith.constant 1 : i32
    %37 = vector.broadcast %c1_i32_19 : i32 to vector<1x256xi32>
    %38 = arith.cmpi sge, %36, %37 : vector<1x256xi32>
    %c14_i32 = arith.constant 14 : i32
    %39 = vector.broadcast %c14_i32 : i32 to vector<1x256xi32>
    %40 = arith.cmpi sle, %36, %39 : vector<1x256xi32>
    %c16_i32_20 = arith.constant 16 : i32
    %41 = vector.broadcast %c16_i32_20 : i32 to vector<1x256xi32>
    %42 = arith.cmpi sge, %20, %41 : vector<1x256xi32>
    %c240_i32 = arith.constant 240 : i32
    %43 = vector.broadcast %c240_i32 : i32 to vector<1x256xi32>
    %44 = arith.cmpi slt, %20, %43 : vector<1x256xi32>
    %cst_21 = arith.constant 0.000000e+00 : f32
    %45 = vector.broadcast %cst_21 : f32 to vector<16x256xf32>
    %c0_22 = arith.constant 0 : index
    %c111 = arith.constant 111 : index
    %46 = vector.load %arg11[%c0_22, %c111] : memref<144x512xf32, #tpu.memory_space<vmem>>, vector<16x256xf32>
    %47 = arith.andi %42, %38 : vector<1x256xi1>
    %cst_23 = arith.constant 0.000000e+00 : f32
    %48 = vector.shape_cast %47 : vector<1x256xi1> to vector<1x256xi1>
    %49 = vector.broadcast %48 : vector<1x256xi1> to vector<16x256xi1>
    %50 = vector.broadcast %cst_23 : f32 to vector<16x256xf32>
    %51 = arith.select %49, %46, %50 : vector<16x256xi1>, vector<16x256xf32>
    %52 = arith.addf %45, %51 : vector<16x256xf32>
    %c16 = arith.constant 16 : index
    %c112 = arith.constant 112 : index
    %53 = vector.load %arg11[%c16, %c112] : memref<144x512xf32, #tpu.memory_space<vmem>>, vector<16x256xf32>
    %cst_24 = arith.constant 0.000000e+00 : f32
    %54 = vector.shape_cast %42 : vector<1x256xi1> to vector<1x256xi1>
    %55 = vector.broadcast %54 : vector<1x256xi1> to vector<16x256xi1>
    %56 = vector.broadcast %cst_24 : f32 to vector<16x256xf32>
    %57 = arith.select %55, %53, %56 : vector<16x256xi1>, vector<16x256xf32>
    %58 = arith.addf %52, %57 : vector<16x256xf32>
    %c32 = arith.constant 32 : index
    %c113 = arith.constant 113 : index
    %59 = vector.load %arg11[%c32, %c113] : memref<144x512xf32, #tpu.memory_space<vmem>>, vector<16x256xf32>
    %60 = arith.andi %42, %40 : vector<1x256xi1>
    %cst_25 = arith.constant 0.000000e+00 : f32
    %61 = vector.shape_cast %60 : vector<1x256xi1> to vector<1x256xi1>
    %62 = vector.broadcast %61 : vector<1x256xi1> to vector<16x256xi1>
    %63 = vector.broadcast %cst_25 : f32 to vector<16x256xf32>
    %64 = arith.select %62, %59, %63 : vector<16x256xi1>, vector<16x256xf32>
    %65 = arith.addf %58, %64 : vector<16x256xf32>
    %c48 = arith.constant 48 : index
    %c127 = arith.constant 127 : index
    %66 = vector.load %arg11[%c48, %c127] : memref<144x512xf32, #tpu.memory_space<vmem>>, vector<16x256xf32>
    %cst_26 = arith.constant 0.000000e+00 : f32
    %67 = vector.shape_cast %38 : vector<1x256xi1> to vector<1x256xi1>
    %68 = vector.broadcast %67 : vector<1x256xi1> to vector<16x256xi1>
    %69 = vector.broadcast %cst_26 : f32 to vector<16x256xf32>
    %70 = arith.select %68, %66, %69 : vector<16x256xi1>, vector<16x256xf32>
    %71 = arith.addf %65, %70 : vector<16x256xf32>
    %c64 = arith.constant 64 : index
    %c128_27 = arith.constant 128 : index
    %72 = vector.load %arg11[%c64, %c128_27] : memref<144x512xf32, #tpu.memory_space<vmem>>, vector<16x256xf32>
    %73 = arith.addf %71, %72 : vector<16x256xf32>
    %c80 = arith.constant 80 : index
    %c129 = arith.constant 129 : index
    %74 = vector.load %arg11[%c80, %c129] : memref<144x512xf32, #tpu.memory_space<vmem>>, vector<16x256xf32>
    %cst_28 = arith.constant 0.000000e+00 : f32
    %75 = vector.shape_cast %40 : vector<1x256xi1> to vector<1x256xi1>
    %76 = vector.broadcast %75 : vector<1x256xi1> to vector<16x256xi1>
    %77 = vector.broadcast %cst_28 : f32 to vector<16x256xf32>
    %78 = arith.select %76, %74, %77 : vector<16x256xi1>, vector<16x256xf32>
    %79 = arith.addf %73, %78 : vector<16x256xf32>
    %c96 = arith.constant 96 : index
    %c143 = arith.constant 143 : index
    %80 = vector.load %arg11[%c96, %c143] : memref<144x512xf32, #tpu.memory_space<vmem>>, vector<16x256xf32>
    %81 = arith.andi %44, %38 : vector<1x256xi1>
    %cst_29 = arith.constant 0.000000e+00 : f32
    %82 = vector.shape_cast %81 : vector<1x256xi1> to vector<1x256xi1>
    %83 = vector.broadcast %82 : vector<1x256xi1> to vector<16x256xi1>
    %84 = vector.broadcast %cst_29 : f32 to vector<16x256xf32>
    %85 = arith.select %83, %80, %84 : vector<16x256xi1>, vector<16x256xf32>
    %86 = arith.addf %79, %85 : vector<16x256xf32>
    %c112_30 = arith.constant 112 : index
    %c144 = arith.constant 144 : index
    %87 = vector.load %arg11[%c112_30, %c144] : memref<144x512xf32, #tpu.memory_space<vmem>>, vector<16x256xf32>
    %cst_31 = arith.constant 0.000000e+00 : f32
    %88 = vector.shape_cast %44 : vector<1x256xi1> to vector<1x256xi1>
    %89 = vector.broadcast %88 : vector<1x256xi1> to vector<16x256xi1>
    %90 = vector.broadcast %cst_31 : f32 to vector<16x256xf32>
    %91 = arith.select %89, %87, %90 : vector<16x256xi1>, vector<16x256xf32>
    %92 = arith.addf %86, %91 : vector<16x256xf32>
    %c128_32 = arith.constant 128 : index
    %c145 = arith.constant 145 : index
    %93 = vector.load %arg11[%c128_32, %c145] : memref<144x512xf32, #tpu.memory_space<vmem>>, vector<16x256xf32>
    %94 = arith.andi %44, %40 : vector<1x256xi1>
    %cst_33 = arith.constant 0.000000e+00 : f32
    %95 = vector.shape_cast %94 : vector<1x256xi1> to vector<1x256xi1>
    %96 = vector.broadcast %95 : vector<1x256xi1> to vector<16x256xi1>
    %97 = vector.broadcast %cst_33 : f32 to vector<16x256xf32>
    %98 = arith.select %96, %93, %97 : vector<16x256xi1>, vector<16x256xf32>
    %99 = arith.addf %92, %98 : vector<16x256xf32>
    %c0_34 = arith.constant 0 : index
    %c0_35 = arith.constant 0 : index
    %100 = vector.load %arg7[%c0_34, %c0_35] : memref<16x1xf32, #tpu.memory_space<vmem>>, vector<16x1xf32>
    %101 = vector.broadcast %100 : vector<16x1xf32> to vector<16x256xf32>
    %102 = arith.mulf %99, %101 : vector<16x256xf32>
    %c0_36 = arith.constant 0 : index
    %c0_37 = arith.constant 0 : index
    %103 = vector.load %arg8[%c0_36, %c0_37] : memref<16x1xf32, #tpu.memory_space<vmem>>, vector<16x1xf32>
    %104 = vector.broadcast %103 : vector<16x1xf32> to vector<16x256xf32>
    %105 = arith.addf %102, %104 : vector<16x256xf32>
    %cst_38 = arith.constant 0.000000e+00 : f32
    %106 = vector.broadcast %cst_38 : f32 to vector<16x256xf32>
    %107 = arith.maximumf %105, %106 : vector<16x256xf32>
    %c0_39 = arith.constant 0 : index
    %c0_40 = arith.constant 0 : index
    %108 = vector.load %arg9[%c0_39, %c0_40] : memref<32x16xf32, #tpu.memory_space<vmem>>, vector<32x16xf32>
    %cst_41 = arith.constant dense<0.000000e+00> : vector<32x256xf32>
    %109 = tpu.matmul %108, %107, %cst_41 {dimension_numbers = #tpu.dot_dimension_numbers<[1], [0], [0], [1], [0, 0, 1, 1], [], []>} : vector<32x16xf32>, vector<16x256xf32>, vector<32x256xf32> -> vector<32x256xf32>
    %110 = arith.addf %1, %109 : vector<32x256xf32>
    %111 = vector.extract_strided_slice %110 {offsets = [0, 0], sizes = [16, 256], strides = [1, 1]} : vector<32x256xf32> to vector<16x256xf32>
    %c0_42 = arith.constant 0 : index
    %c0_43 = arith.constant 0 : index
    %c0_44 = arith.constant 0 : index
    %112 = vector.load %arg10[%c0_42, %c0_43, %c0_44] : memref<1x48x256xf32, #tpu.memory_space<vmem>>, vector<1x16x256xf32>
    %113 = vector.shape_cast %112 : vector<1x16x256xf32> to vector<16x256xf32>
    %114 = vector.shape_cast %111 : vector<16x256xf32> to vector<1x16x256xf32>
    tpu.vector_store %arg10[%c0_42, %c0_43, %c0_44], %114 {strides = array<i32>} : memref<1x48x256xf32, #tpu.memory_space<vmem>>, vector<1x16x256xf32>,
    %115 = vector.extract_strided_slice %99 {offsets = [8, 0], sizes = [8, 256], strides = [1, 1]} : vector<16x256xf32> to vector<8x256xf32>
    %c0_45 = arith.constant 0 : index
    %c16_46 = arith.constant 16 : index
    %c0_47 = arith.constant 0 : index
    %116 = vector.load %arg10[%c0_45, %c16_46, %c0_47] : memref<1x48x256xf32, #tpu.memory_space<vmem>>, vector<1x8x256xf32>
    %117 = vector.shape_cast %116 : vector<1x8x256xf32> to vector<8x256xf32>
    %118 = vector.shape_cast %115 : vector<8x256xf32> to vector<1x8x256xf32>
    tpu.vector_store %arg10[%c0_45, %c16_46, %c0_47], %118 {strides = array<i32>} : memref<1x48x256xf32, #tpu.memory_space<vmem>>, vector<1x8x256xf32>,
    %119 = vector.extract_strided_slice %110 {offsets = [16, 0], sizes = [16, 256], strides = [1, 1]} : vector<32x256xf32> to vector<16x256xf32>
    %c0_48 = arith.constant 0 : index
    %c24 = arith.constant 24 : index
    %c0_49 = arith.constant 0 : index
    %120 = vector.load %arg10[%c0_48, %c24, %c0_49] : memref<1x48x256xf32, #tpu.memory_space<vmem>>, vector<1x16x256xf32>
    %121 = vector.shape_cast %120 : vector<1x16x256xf32> to vector<16x256xf32>
    %122 = vector.shape_cast %119 : vector<16x256xf32> to vector<1x16x256xf32>
    tpu.vector_store %arg10[%c0_48, %c24, %c0_49], %122 {strides = array<i32>} : memref<1x48x256xf32, #tpu.memory_space<vmem>>, vector<1x16x256xf32>,
    %123 = vector.extract_strided_slice %99 {offsets = [0, 0], sizes = [8, 256], strides = [1, 1]} : vector<16x256xf32> to vector<8x256xf32>
    %c0_50 = arith.constant 0 : index
    %c40 = arith.constant 40 : index
    %c0_51 = arith.constant 0 : index
    %124 = vector.load %arg10[%c0_50, %c40, %c0_51] : memref<1x48x256xf32, #tpu.memory_space<vmem>>, vector<1x8x256xf32>
    %125 = vector.shape_cast %124 : vector<1x8x256xf32> to vector<8x256xf32>
    %126 = vector.shape_cast %123 : vector<8x256xf32> to vector<1x8x256xf32>
    tpu.vector_store %arg10[%c0_50, %c40, %c0_51], %126 {strides = array<i32>} : memref<1x48x256xf32, #tpu.memory_space<vmem>>, vector<1x8x256xf32>,
    return
  }
  func.func @transform_0(%arg0: i32) -> (i32, i32, i32) {
    %c0_i32 = arith.constant 0 : i32
    %c0_i32_0 = arith.constant 0 : i32
    %c0_i32_1 = arith.constant 0 : i32
    return %arg0, %c0_i32, %c0_i32_0 : i32, i32, i32
  }
  func.func @transform_1(%arg0: i32) -> (i32, i32) {
    %c0_i32 = arith.constant 0 : i32
    %c0_i32_0 = arith.constant 0 : i32
    %c0_i32_1 = arith.constant 0 : i32
    return %c0_i32, %c0_i32_0 : i32, i32
  }
  func.func @transform_2(%arg0: i32) -> (i32, i32) {
    %c0_i32 = arith.constant 0 : i32
    %c0_i32_0 = arith.constant 0 : i32
    %c0_i32_1 = arith.constant 0 : i32
    return %c0_i32, %c0_i32_0 : i32, i32
  }
  func.func @transform_3(%arg0: i32) -> (i32, i32) {
    %c0_i32 = arith.constant 0 : i32
    %c0_i32_0 = arith.constant 0 : i32
    %c0_i32_1 = arith.constant 0 : i32
    return %c0_i32, %c0_i32_0 : i32, i32
  }
  func.func @transform_4(%arg0: i32) -> (i32, i32) {
    %c0_i32 = arith.constant 0 : i32
    %c0_i32_0 = arith.constant 0 : i32
    %c0_i32_1 = arith.constant 0 : i32
    return %c0_i32, %c0_i32_0 : i32, i32
  }
  func.func @transform_5(%arg0: i32) -> (i32, i32) {
    %c0_i32 = arith.constant 0 : i32
    %c0_i32_0 = arith.constant 0 : i32
    %c0_i32_1 = arith.constant 0 : i32
    return %c0_i32, %c0_i32_0 : i32, i32
  }
  func.func @transform_6(%arg0: i32) -> (i32, i32) {
    %c0_i32 = arith.constant 0 : i32
    %c0_i32_0 = arith.constant 0 : i32
    %c0_i32_1 = arith.constant 0 : i32
    return %c0_i32, %c0_i32_0 : i32, i32
  }
  func.func @transform_7(%arg0: i32) -> (i32, i32) {
    %c0_i32 = arith.constant 0 : i32
    %c0_i32_0 = arith.constant 0 : i32
    %c0_i32_1 = arith.constant 0 : i32
    return %c0_i32, %c0_i32_0 : i32, i32
  }
  func.func @transform_8(%arg0: i32) -> (i32, i32) {
    %c0_i32 = arith.constant 0 : i32
    %c0_i32_0 = arith.constant 0 : i32
    %c0_i32_1 = arith.constant 0 : i32
    return %c0_i32, %c0_i32_0 : i32, i32
  }
  func.func @transform_9(%arg0: i32) -> (i32, i32, i32) {
    %c0_i32 = arith.constant 0 : i32
    %c0_i32_0 = arith.constant 0 : i32
    %c0_i32_1 = arith.constant 0 : i32
    return %arg0, %c0_i32, %c0_i32_0 : i32, i32, i32
  }
}

</mosaic_0001>

<bundles_post_ra>
// kernel: tpu_custom_call.1
= control target key start
LH: loop header
LB: loop body
LE: loop exit
PB: predicated region body
PF: predicated region fallthrough
CT: control target
= control target key end

     0   :  { %14 = vsyncpa [#allocation4], 0  ;;  %s2324_s0 = inlined_call_operand.vmem [shape: f32[2,32,256], index: 0, kind: input, shape index: {}]   ;;  %s2325_s1 = inlined_call_operand.vmem [shape: f32[32,1], index: 1, kind: input, shape index: {}]   ;;  %s2326_s2 = inlined_call_operand.vmem [shape: f32[32,1], index: 2, kind: input, shape index: {}]   ;;  %s2327_s3 = inlined_call_operand.vmem [shape: f32[64,32], index: 3, kind: input, shape index: {}]   ;;  %s2328_s4 = inlined_call_operand.vmem [shape: f32[64,1], index: 4, kind: input, shape index: {}]   ;;  %s2329_s5 = inlined_call_operand.vmem [shape: f32[144,64], index: 5, kind: input, shape index: {}]   ;;  %s2330_s6 = inlined_call_operand.vmem [shape: f32[16,1], index: 6, kind: input, shape index: {}]   ;;  %s2331_s7 = inlined_call_operand.vmem [shape: f32[16,1], index: 7, kind: input, shape index: {}]   ;;  %s2332_s8 = inlined_call_operand.vmem [shape: f32[32,16], index: 8, kind: input, shape index: {}]   ;;  %s2333_s9 = inlined_call_operand.hbm [shape: f32[2,48,256], index: 9, kind: output, shape index: {}]  }
   0x1   :  { %16 = vsyncpa [#allocation4 + $0x1], 0  ;;  %s1732_s30 = smov 0   ;;  %s1734_s10 = smov 0  }
   0x2   :  { %s1736_s11 = smov 0   ;;  %s1738_s12 = smov 0  }
   0x3 LB: > { %s1753_s13 = sadd.s32 4294967295, %s1670_s12   ;;  %s1460_s14 = sadd.s32 4294967294, %s1670_s12   ;;  %s1670_s12 = sphi %s1738_s12, %s2364_s12   ;;  %s1666_s11 = sphi %s1736_s11, %s2363_s11   ;;  %s1662_s10 = sphi %s1734_s10, %s2362_s10   ;;  %s1658_s30 = sphi %s1732_s30, %s2361_s30  }
   0x4   : > { %s1757_s15 = sadd.s32 1, %s1670_s12   ;;  %s223_s16 = sadd.s32 1, %s1666_s11 }
   0x5   : > { %s220_s17 = ssub.s32 %s1670_s12, %s1757_s15  ;;  %p233_p0 = scmp.ne.s32.totalorder %s1666_s11, %s1662_s10 }
   0x6   : > { %p221_p1 = scmp.eq.s32.totalorder %s220_s17, 0  ;;  %p234_p2 = scmp.eq.s32.totalorder %s1753_s13, 1 }
   0x7   : > { %p239_p3 = scmp.ne.s32.totalorder %s1662_s10, %s1658_s30  ;;  %p240_p4 = scmp.eq.s32.totalorder %s1460_s14, 1 }
   0x8   : > { %s1768_s18 = scalar_select %p221_p1, %s1666_s11, %s223_s16  }
   0x9   : > { %p1770_p5 = por %p234_p2, %p233_p0  ;;  %p1774_p6 = por %p240_p4, %p239_p3 }
   0xa   : > { %p1463_p7 = scmp.ge.s32.totalorder %s1670_s12, 1  ;;  %p290_p8 = scmp.lt.s32.totalorder %s1670_s12, 3 }
   0xc   : > { %p291_p9 = pnand %p1463_p7, %p290_p8 }
   0xd   : > { %s1673_s29 = smov (!%p291_p9), 17   ;;  %s1674_s14 = smov (!%p291_p9), 16  }
   0xe   : > { %294 = sbr.rel (%p291_p9) target bundleno = 893 (0x37d), region = 56  ;;  %s1675_s16 = smov (!%p291_p9), 15  }
   0xf   : > { %s2334_s17 = smov (!%p291_p9), 1   ;;  %p326_p10 = scmp.lt.s32.totalorder (!%p291_p9), %s1753_s13, 1 }
  0x10   : > { %s1677_s21 = smov (!%p291_p9), 127   ;;  %s1678_s25 = smov (!%p291_p9), 113  }
  0x11   : > { %s2338_s26 = smov (!%p291_p9), 112  }
  0x13   : > { %v373_v0 = vld [vmem:[%s2326_s2 + $0x10] sm:$0xff]  ;;  %v374_v1 = vld [vmem:[%s2326_s2 + $0x18] sm:$0xff]  ;;  %v1672_v3 = vmov 0   ;;  %v339_v4 = vld [vmem:[%s2325_s1] sm:$0xff]  ;;  %s327_s23 = scalar_select %p326_p10, %s1753_s13, 1  ;;  %vm467_vm0 = vcmask 261120  }
  0x14   : > { %v342_v2 = vld [vmem:[%s2325_s1 + $0x18] sm:$0xff]  ;;  %1599 = vset.pattern.permute.xlu2 %v1672_v3  ;;  %1598 = vset.pattern.permute.xlu1 %v1672_v3  ;;  %v341_v5 = vld [vmem:[%s2325_s1 + $0x10] sm:$0xff]  ;;  %v340_v6 = vld [vmem:[%s2325_s1 + $0x8] sm:$0xff]  ;;  %vm608_vm1 = vcmask 523264   ;;  %vm951_vm3 = vcmask 130048   ;;  %vm906_vm5 = vcmask 138240  }
  0x15   : > { %1597 = vset.pattern.permute.xlu0 %v1672_v3  ;;  %387 = vperm.xlu2 %1599, %v373_v0   ;;  %v426_v7 = vld [vmem:[%s2328_s4 + $0x38] sm:$0xff]  ;;  %v372_v8 = vld [vmem:[%s2326_s2 + $0x8] sm:$0xff]  ;;  %v371_v9 = vld [vmem:[%s2326_s2] sm:$0xff]  ;;  %s1529_s24 = sshll.u32 %s327_s23, 6  ;;  %vm998_vm8 = vcmask 121856   ;;  %vm1043_vm12 = vcmask 7168  }
  0x16   : > { %392 = vperm.xlu1 %1598, %v374_v1   ;;  %360 = vperm.xlu0 %1597, %v342_v2   ;;  %v423_v10 = vld [vmem:[%s2328_s4 + $0x20] sm:$0xff]  ;;  %v425_v11 = vld [vmem:[%s2328_s4 + $0x30] sm:$0xff]  ;;  %v424_v12 = vld [vmem:[%s2328_s4 + $0x28] sm:$0xff]  ;;  %s1843_s27 = scalar_lea.vmem %s2324_s0, %s1529_s24  ;;  %s2336_s24 = smov 111   ;;  %vm1096_vm13 = vcmask 1039360   ;;  %vm1143_vm15 = vcmask 924672  }
  0x17   : > { %v420_v13 = vld [vmem:[%s2328_s4 + $0x8] sm:$0xff]  ;;  %v422_v14 = vld [vmem:[%s2328_s4 + $0x18] sm:$0xff]  ;;  %v421_v15 = vld [vmem:[%s2328_s4 + $0x10] sm:$0xff]  ;;  %s323_s23 = sand.u32 1, %s1662_s10  }
  0x18   : > { %v419_v16 = vld [vmem:[%s2328_s4] sm:$0xff]  ;;  %v879_v17 = vld [vmem:[#allocation2 + $0x30] sm:$0xff]  ;;  %v876_v19 = vld [vmem:[#allocation2 + $0xc8] sm:$0xff] }
  0x19   : > { %v926_v18 = vld [vmem:[#allocation2] sm:$0xff]  ;;  %v968_v21 = vld [vmem:[#allocation2 + $0x238] sm:$0xff]  ;;  %v1018_v22 = vld [vmem:[#allocation2 + $0x190] sm:$0xff] }
  0x1a   : > { %v923_v20 = vld [vmem:[#allocation2 + $0xe0] sm:$0xff]  ;;  %v1015_v23 = vld [vmem:[#allocation2 + $0x68] sm:$0xff]  ;;  %v337_v25 = vld [vmem:[%s1843_s27 + $0x30] sm:$0xff] }
  0x1b   : > { %v1253_v24 = vld [vmem:[%s2330_s6 + $0x8] sm:$0xff]  ;;  %v338_v26 = vld [vmem:[%s1843_s27 + $0x38] sm:$0xff]  ;;  %v335_v36 = vld [vmem:[%s1843_s27 + $0x20] sm:$0xff] }
  0x1c   : > { %v336_v37 = vld [vmem:[%s1843_s27 + $0x28] sm:$0xff]  ;;  %v331_v42 = vld [vmem:[%s1843_s27] sm:$0xff]  ;;  %v333_v46 = vld [vmem:[%s1843_s27 + $0x10] sm:$0xff] }
  0x1d   : > { %345 = vperm.xlu2 %1599, %v339_v4   ;;  %v332_v45 = vld [vmem:[%s1843_s27 + $0x8] sm:$0xff]  ;;  %v334_v47 = vld [vmem:[%s1843_s27 + $0x18] sm:$0xff]  ;;  %v411_v1 = vld [vmem:[%s2327_s3] sm:$0xff] }
  0x1e   : > { %355 = vperm.xlu0 %1597, %v341_v5   ;;  %350 = vperm.xlu1 %1598, %v340_v6   ;;  %v412_v2 = vld [vmem:[%s2327_s3 + $0x8] sm:$0xff]  ;;  %v413_v3 = vld [vmem:[%s2327_s3 + $0x10] sm:$0xff]  ;;  %v414_v4 = vld [vmem:[%s2327_s3 + $0x18] sm:$0xff] }
  0x1f   : > { %v415_v5 = vld [vmem:[%s2327_s3 + $0x20] sm:$0xff]  ;;  %v416_v6 = vld [vmem:[%s2327_s3 + $0x28] sm:$0xff] }
  0x25   : > { %464 = vperm.xlu2 %1599, %v426_v7   ;;  %v417_v7 = vld [vmem:[%s2327_s3 + $0x30] sm:$0xff] }
  0x26   : > { %382 = vperm.xlu0 %1597, %v372_v8   ;;  %377 = vperm.xlu1 %1598, %v371_v9   ;;  %v418_v8 = vld [vmem:[%s2327_s3 + $0x38] sm:$0xff] }
  0x2d   : > { %449 = vperm.xlu2 %1599, %v423_v10  }
  0x2e   : > { %459 = vperm.xlu0 %1597, %v425_v11   ;;  %454 = vperm.xlu1 %1598, %v424_v12  }
  0x35   : > { %434 = vperm.xlu2 %1599, %v420_v13  }
  0x36   : > { %444 = vperm.xlu0 %1597, %v422_v14   ;;  %439 = vperm.xlu1 %1598, %v421_v15  }
  0x3e   : > { %429 = vperm.xlu0 %1597, %v419_v16   ;;  %900 = vrot.lane.b32.xlu1 %v879_v17, %s1673_s29 }
  0x46   : > { %945 = vrot.lane.b32.xlu1 %v926_v18, %s1674_s14 }
  0x4e   : > { %894 = vrot.lane.b32.xlu1 %v876_v19, %s1673_s29 }
  0x56   : > { %939 = vrot.lane.b32.xlu1 %v923_v20, %s1674_s14 }
  0x5e   : > { %986 = vrot.lane.b32.xlu1 %v968_v21, %s1675_s16 }
  0x66   : > { %1037 = vrot.lane.b32.xlu1 %v1018_v22, %s2334_s17 }
  0x6e   : > { %1031 = vrot.lane.b32.xlu1 %v1015_v23, %s2334_s17 }
  0x6f   : > { %v388_v31 = vpop.permute.xlu2 %387 }
  0x76   : > { %1261 = vperm.xlu1 %1598, %v1253_v24  }
  0x77   : > { %v346_v48 = vpop.permute.xlu2 %345 }
  0x78   : > { %v363_v51 = vmul.f32 %v346_v48, %v331_v42  ;;  %v364_v52 = vmul.f32 %v346_v48, %v332_v45 }
  0x7f   : > { %v465_v21 = vpop.permute.xlu2 %464 }
  0x88   : > { %v393_v27 = vpop.permute.xlu1 %392  ;;  %v361_v28 = vpop.permute.xlu0 %360 }
  0x89   : > { %v369_v29 = vmul.f32 %v361_v28, %v337_v25  ;;  %v370_v30 = vmul.f32 %v361_v28, %v338_v26  ;;  %v450_v26 = vpop.permute.xlu2 %449 }
  0x8b   : > { %v401_v32 = vadd.f32 %v393_v27, %v369_v29  ;;  %v402_v33 = vadd.f32 %v393_v27, %v370_v30 }
  0x8d   : > { %v409_v34 = vmax.f32 %v401_v32, 0.0  ;;  %v410_v35 = vmax.f32 %v402_v33, 0.0 }
  0x8f   : > { %504 = vmatpush.msra.mxu0 %v409_v34  ;;  %545 = vmatpush.msra.mxu1 %v410_v35 }
  0x90   : > { %v356_v38 = vpop.permute.xlu0 %355  ;;  %v351_v39 = vpop.permute.xlu1 %350 }
  0x91   : > { %v367_v40 = vmul.f32 %v356_v38, %v335_v36  ;;  %v368_v41 = vmul.f32 %v356_v38, %v336_v37  ;;  %v365_v53 = vmul.f32 %v351_v39, %v333_v46  ;;  %v366_v54 = vmul.f32 %v351_v39, %v334_v47 }
  0x93   : > { %v399_v43 = vadd.f32 %v388_v31, %v367_v40  ;;  %v400_v44 = vadd.f32 %v388_v31, %v368_v41 }
  0x95   : > { %v407_v49 = vmax.f32 %v399_v43, 0.0  ;;  %v408_v50 = vmax.f32 %v400_v44, 0.0 }
  0x97   : > { %505 = vmatpush.msra.mxu0 %v407_v49  ;;  %546 = vmatpush.msra.mxu1 %v408_v50  ;;  %v435_v49 = vpop.permute.xlu2 %434 }
  0x98   : > { %v383_v55 = vpop.permute.xlu0 %382  ;;  %v378_v56 = vpop.permute.xlu1 %377 }
  0x99   : > { %v397_v57 = vadd.f32 %v383_v55, %v365_v53  ;;  %v398_v58 = vadd.f32 %v383_v55, %v366_v54  ;;  %v395_v59 = vadd.f32 %v378_v56, %v363_v51  ;;  %v396_v60 = vadd.f32 %v378_v56, %v364_v52 }
  0x9b   : > { %v405_v61 = vmax.f32 %v397_v57, 0.0  ;;  %v406_v62 = vmax.f32 %v398_v58, 0.0  ;;  %v403_v63 = vmax.f32 %v395_v59, 0.0  ;;  %v404_v0 = vmax.f32 %v396_v60, 0.0 }
  0x9d   : > { %506 = vmatpush.msra.mxu0 %v405_v61  ;;  %547 = vmatpush.msra.mxu1 %v406_v62 }
  0x9f   : > { %507 = vmatpush.msra.mxu0 %v403_v63  ;;  %548 = vmatpush.msra.mxu1 %v404_v0 }
  0xa0   : > { %1466 = vmatmul.msk.f32.vlgmr.msra.gmra.mxu0 %vm467_vm0, %v411_v1  ;;  %1474 = vmatmul.msk.f32.vlgmr.msra.gmra.mxu1 %vm467_vm0, %v411_v1  ;;  %v460_v22 = vpop.permute.xlu0 %459  ;;  %v455_v25 = vpop.permute.xlu1 %454  ;;  %v590_v1 = vld [vmem:[%s2329_s5] sm:$0xff] }
  0xa8   : > { %1467 = vmatmul.msk.f32.gmra.mxu0 %vm467_vm0, %v412_v2  ;;  %1475 = vmatmul.msk.f32.gmra.mxu1 %vm467_vm0, %v412_v2  ;;  %v445_v32 = vpop.permute.xlu0 %444  ;;  %v440_v44 = vpop.permute.xlu1 %439  ;;  %v593_v2 = vld [vmem:[%s2329_s5 + $0x18] sm:$0xff] }
  0xb0   : > { %1468 = vmatmul.msk.f32.gmra.mxu0 %vm467_vm0, %v413_v3  ;;  %1476 = vmatmul.msk.f32.gmra.mxu1 %vm467_vm0, %v413_v3  ;;  %v430_v54 = vpop.permute.xlu0 %429  ;;  %v594_v3 = vld [vmem:[%s2329_s5 + $0x20] sm:$0xff] }
  0xb8   : > { %1469 = vmatmul.msk.f32.gmra.mxu0 %vm467_vm0, %v414_v4  ;;  %1477 = vmatmul.msk.f32.gmra.mxu1 %vm467_vm0, %v414_v4  ;;  %v591_v4 = vld [vmem:[%s2329_s5 + $0x8] sm:$0xff] }
  0xc0   : > { %1470 = vmatmul.msk.f32.gmra.mxu0 %vm467_vm0, %v415_v5  ;;  %1478 = vmatmul.msk.f32.gmra.mxu1 %vm467_vm0, %v415_v5  ;;  %v595_v5 = vld [vmem:[%s2329_s5 + $0x28] sm:$0xff] }
  0xc8   : > { %1471 = vmatmul.msk.f32.gmra.mxu0 %vm467_vm0, %v416_v6  ;;  %1479 = vmatmul.msk.f32.gmra.mxu1 %vm467_vm0, %v416_v6  ;;  %v592_v6 = vld [vmem:[%s2329_s5 + $0x10] sm:$0xff] }
  0xd0   : > { %1472 = vmatmul.msk.f32.gmra.mxu0 %vm467_vm0, %v417_v7  ;;  %1480 = vmatmul.msk.f32.gmra.mxu1 %vm467_vm0, %v417_v7  ;;  %v596_v7 = vld [vmem:[%s2329_s5 + $0x30] sm:$0xff] }
  0xd8   : > { %1473 = vmatmul.msk.f32.gmra.mxu0 %vm467_vm0, %v418_v8  ;;  %1481 = vmatmul.msk.f32.gmra.mxu1 %vm467_vm0, %v418_v8  ;;  %v597_v8 = vld [vmem:[%s2329_s5 + $0x38] sm:$0xff] }
 0x11d   : > { %v1893_v9 = vpop.f32.mrf.mxu0  ;;  %v1895_v10 = vpop.f32.mrf.mxu1 }
 0x11e   : > { %v510_v57 = vadd.f32 %v1893_v9, %v430_v54  ;;  %v551_v59 = vadd.f32 %v1895_v10, %v430_v54  ;;  %v598_v9 = vld [vmem:[%s2329_s5 + $0x40] sm:$0xff]  ;;  %v599_v10 = vld [vmem:[%s2329_s5 + $0x48] sm:$0xff] }
 0x120   : > { %v574_v63 = vmax.f32 %v510_v57, 0.0  ;;  %v575_v0 = vmax.f32 %v551_v59, 0.0 }
 0x125   : > { %v512_v11 = vpop.f32.mrf.mxu0  ;;  %v553_v12 = vpop.f32.mrf.mxu1 }
 0x126   : > { %v513_v52 = vadd.f32 %v512_v11, %v435_v49  ;;  %v554_v55 = vadd.f32 %v553_v12, %v435_v49  ;;  %v971_v11 = vld [vmem:[#allocation2 + $0xd0] sm:$0xff]  ;;  %v901_v49 = vpop.permute.xlu1 %900 }
 0x127   : > { %992 = vrot.lane.b32.xlu0 %v971_v11, %s1675_s16  ;;  %v600_v12 = vld [vmem:[%s2329_s5 + $0x50] sm:$0xff] }
 0x128   : > { %v576_v61 = vmax.f32 %v513_v52, 0.0  ;;  %v577_v62 = vmax.f32 %v554_v55, 0.0 }
 0x12d   : > { %v515_v13 = vpop.f32.mrf.mxu0  ;;  %v556_v14 = vpop.f32.mrf.mxu1 }
 0x12e   : > { %v516_v47 = vadd.f32 %v515_v13, %v440_v44  ;;  %v557_v50 = vadd.f32 %v556_v14, %v440_v44  ;;  %v1073_v13 = vld [vmem:[#allocation2 + $0x50] sm:$0xff]  ;;  %v601_v14 = vld [vmem:[%s2329_s5 + $0x58] sm:$0xff]  ;;  %v946_v54 = vpop.permute.xlu1 %945 }
 0x12f   : > { %1094 = vrot.lane.b32.xlu0 %v1073_v13, %s1677_s21 }
 0x130   : > { %v578_v58 = vmax.f32 %v516_v47, 0.0  ;;  %v579_v60 = vmax.f32 %v557_v50, 0.0 }
 0x135   : > { %v518_v15 = vpop.f32.mrf.mxu0  ;;  %v559_v16 = vpop.f32.mrf.mxu1 }
 0x136   : > { %v519_v42 = vadd.f32 %v518_v15, %v445_v32  ;;  %v560_v45 = vadd.f32 %v559_v16, %v445_v32  ;;  %v1070_v15 = vld [vmem:[#allocation2 + $0x1f0] sm:$0xff]  ;;  %v602_v16 = vld [vmem:[%s2329_s5 + $0x60] sm:$0xff] }
 0x137   : > { %1088 = vrot.lane.b32.xlu0 %v1070_v15, %s1677_s21 }
 0x138   : > { %v580_v53 = vmax.f32 %v519_v42, 0.0  ;;  %v581_v56 = vmax.f32 %v560_v45, 0.0 }
 0x13d   : > { %v521_v17 = vpop.f32.mrf.mxu0  ;;  %v562_v18 = vpop.f32.mrf.mxu1 }
 0x13e   : > { %v522_v38 = vadd.f32 %v521_v17, %v450_v26  ;;  %v563_v40 = vadd.f32 %v562_v18, %v450_v26  ;;  %v1118_v17 = vld [vmem:[#allocation2 + $0x108] sm:$0xff]  ;;  %v1165_v18 = vld [vmem:[#allocation2 + $0xc0] sm:$0xff] }
 0x13f   : > { %1141 = vrot.lane.b32.xlu0 %v1118_v17, %s1678_s25  ;;  %1186 = vrot.lane.b32.xlu2 %v1165_v18, %s2338_s26  ;;  %v606_v26 = vld [vmem:[%s2329_s5 + $0x80] sm:$0xff] }
 0x140   : > { %v582_v48 = vmax.f32 %v522_v38, 0.0  ;;  %v583_v51 = vmax.f32 %v563_v40, 0.0 }
 0x145   : > { %v524_v19 = vpop.f32.mrf.mxu0  ;;  %v565_v20 = vpop.f32.mrf.mxu1 }
 0x146   : > { %v525_v34 = vadd.f32 %v524_v19, %v455_v25  ;;  %v566_v37 = vadd.f32 %v565_v20, %v455_v25  ;;  %v603_v19 = vld [vmem:[%s2329_s5 + $0x68] sm:$0xff]  ;;  %v1115_v20 = vld [vmem:[#allocation2 + $0x10] sm:$0xff]  ;;  %v605_v25 = vld [vmem:[%s2329_s5 + $0x78] sm:$0xff] }
 0x147   : > { %1135 = vrot.lane.b32.xlu0 %v1115_v20, %s1678_s25 }
 0x148   : > { %v584_v43 = vmax.f32 %v525_v34, 0.0  ;;  %v585_v46 = vmax.f32 %v566_v37, 0.0 }
 0x14d   : > { %v527_v23 = vpop.f32.mrf.mxu0  ;;  %v568_v24 = vpop.f32.mrf.mxu1 }
 0x14e   : > { %v528_v29 = vadd.f32 %v527_v23, %v460_v22  ;;  %v569_v33 = vadd.f32 %v568_v24, %v460_v22  ;;  %v604_v22 = vld [vmem:[%s2329_s5 + $0x70] sm:$0xff]  ;;  %v1210_v24 = vld [vmem:[#allocation2 + $0xe8] sm:$0xff] }
 0x14f   : > { %v1207_v23 = vld [vmem:[#allocation2 + $0x1d0] sm:$0xff] }
 0x150   : > { %v586_v39 = vmax.f32 %v528_v29, 0.0  ;;  %v587_v41 = vmax.f32 %v569_v33, 0.0  ;;  %1227 = vrot.lane.b32.xlu0 %v1207_v23, %s2336_s24 }
 0x155   : > { %v530_v27 = vpop.f32.mrf.mxu0  ;;  %v571_v28 = vpop.f32.mrf.mxu1 }
 0x156   : > { %v531_v30 = vadd.f32 %v530_v27, %v465_v21  ;;  %v572_v31 = vadd.f32 %v571_v28, %v465_v21  ;;  %v1162_v21 = vld [vmem:[#allocation2 + $0x130] sm:$0xff]  ;;  %v607_v27 = vld [vmem:[%s2329_s5 + $0x88] sm:$0xff] }
 0x157   : > { %1180 = vrot.lane.b32.xlu2 %v1162_v21, %s2338_s26  ;;  %s2342_s26 = smov 1  }
 0x158   : > { %v588_v35 = vmax.f32 %v531_v30, 0.0  ;;  %v589_v36 = vmax.f32 %v572_v31, 0.0 }
 0x15a   : > { %671 = vmatpush.msrb.mxu0 %v588_v35  ;;  %1530 = vmatpush.msra.mxu2 %v588_v35 }
 0x15b   : > { %742 = vmatpush.msrb.mxu1 %v589_v36  ;;  %1538 = vmatpush.msra.mxu3 %v589_v36 }
 0x15c   : > { %672 = vmatpush.msrb.mxu0 %v586_v39  ;;  %1531 = vmatpush.msra.mxu2 %v586_v39 }
 0x15d   : > { %743 = vmatpush.msrb.mxu1 %v587_v41  ;;  %1539 = vmatpush.msra.mxu3 %v587_v41 }
 0x15e   : > { %673 = vmatpush.msrb.mxu0 %v584_v43  ;;  %1532 = vmatpush.msra.mxu2 %v584_v43 }
 0x15f   : > { %744 = vmatpush.msrb.mxu1 %v585_v46  ;;  %1540 = vmatpush.msra.mxu3 %v585_v46 }
 0x160   : > { %674 = vmatpush.msrb.mxu0 %v582_v48  ;;  %1533 = vmatpush.msra.mxu2 %v582_v48 }
 0x161   : > { %745 = vmatpush.msrb.mxu1 %v583_v51  ;;  %1541 = vmatpush.msra.mxu3 %v583_v51 }
 0x162   : > { %675 = vmatpush.msrb.mxu0 %v580_v53  ;;  %1534 = vmatpush.msra.mxu2 %v580_v53 }
 0x163   : > { %746 = vmatpush.msrb.mxu1 %v581_v56  ;;  %1542 = vmatpush.msra.mxu3 %v581_v56 }
 0x164   : > { %676 = vmatpush.msrb.mxu0 %v578_v58  ;;  %1535 = vmatpush.msra.mxu2 %v578_v58 }
 0x165   : > { %747 = vmatpush.msrb.mxu1 %v579_v60  ;;  %1543 = vmatpush.msra.mxu3 %v579_v60  ;;  %v895_v60 = vpop.permute.xlu1 %894 }
 0x166   : > { %677 = vmatpush.msrb.mxu0 %v576_v61  ;;  %1536 = vmatpush.msra.mxu2 %v576_v61 }
 0x167   : > { %748 = vmatpush.msrb.mxu1 %v577_v62  ;;  %1544 = vmatpush.msra.mxu3 %v577_v62 }
 0x168   : > { %678 = vmatpush.msrb.mxu0 %v574_v63  ;;  %1537 = vmatpush.msra.mxu2 %v574_v63 }
 0x169   : > { %749 = vmatpush.msrb.mxu1 %v575_v0  ;;  %1545 = vmatpush.msra.mxu3 %v575_v0 }
 0x16a   : > { %1482 = vmatmul.msk.f32.vlgmr.msrb.gmra.mxu0 %vm608_vm1, %v590_v1  ;;  %1485 = vmatmul.msk.f32.vlgmr.msra.gmra.mxu2 %vm608_vm1, %v593_v2 }
 0x16b   : > { %1500 = vmatmul.msk.f32.vlgmr.msrb.gmra.mxu1 %vm608_vm1, %v590_v1  ;;  %1503 = vmatmul.msk.f32.vlgmr.msra.gmra.mxu3 %vm608_vm1, %v593_v2 }
 0x16c   : > { %1233 = vrot.lane.b32.xlu2 %v1210_v24, %s2336_s24 }
 0x16d   : > { %v940_v2 = vpop.permute.xlu1 %939 }
 0x172   : > { %1486 = vmatmul.msk.f32.gmra.mxu2 %vm608_vm1, %v594_v3  ;;  %1483 = vmatmul.msk.f32.gmra.mxu0 %vm608_vm1, %v591_v4 }
 0x173   : > { %1504 = vmatmul.msk.f32.gmra.mxu3 %vm608_vm1, %v594_v3  ;;  %1501 = vmatmul.msk.f32.gmra.mxu1 %vm608_vm1, %v591_v4  ;;  %v841_v4 = vlaneseq }
 0x17a   : > { %1487 = vmatmul.msk.f32.gmra.mxu2 %vm608_vm1, %v595_v5  ;;  %1484 = vmatmul.msk.f32.gmra.mxu0 %vm608_vm1, %v592_v6 }
 0x17b   : > { %1505 = vmatmul.msk.f32.gmra.mxu3 %vm608_vm1, %v595_v5  ;;  %1502 = vmatmul.msk.f32.gmra.mxu1 %vm608_vm1, %v592_v6 }
 0x182   : > { %1488 = vmatmul.msk.f32.gmra.mxu2 %vm608_vm1, %v596_v7 }
 0x183   : > { %1506 = vmatmul.msk.f32.gmra.mxu3 %vm608_vm1, %v596_v7 }
 0x18a   : > { %1489 = vmatmul.msk.f32.gmra.mxu2 %vm608_vm1, %v597_v8 }
 0x18b   : > { %1507 = vmatmul.msk.f32.gmra.mxu3 %vm608_vm1, %v597_v8  ;;  %v842_v8 = vand.u32 127, %v841_v4 }
 0x18d   : > { %vm872_vm4 = vcmp.ge.s32.totalorder %v842_v8, 16 }
 0x192   : > { %1490 = vmatmul.msk.f32.gmra.mxu2 %vm608_vm1, %v598_v9 }
 0x193   : > { %1508 = vmatmul.msk.f32.gmra.mxu3 %vm608_vm1, %v598_v9  ;;  %v987_v9 = vpop.permute.xlu1 %986 }
 0x199   : > { %v2021_v48 = vpop.permute.xlu0 %992  ;;  %v2024_v50 = vpop.permute.xlu2 %1186 }
 0x19a   : > { %1491 = vmatmul.msk.f32.gmra.mxu2 %vm608_vm1, %v599_v10 }
 0x19b   : > { %1509 = vmatmul.msk.f32.gmra.mxu3 %vm608_vm1, %v599_v10  ;;  %v848_v10 = vand.u32 15, %v842_v8  ;;  %v2067_v20 = vpop.permute.xlu1 %1037 }
 0x19d   : > { %vm2050_vm2 = vcmp.ge.s32.totalorder %v848_v10, 1  ;;  %vm2085_vm7 = vcmp.le.s32.totalorder %v848_v10, 14 }
 0x19e   : > { %vm2059_vm6 = vmand %vm872_vm4, %vm2050_vm2 }
 0x19f   : > { %vm2096_vm9 = vmand %vm872_vm4, %vm2085_vm7 }
 0x1a1   : > { %v2028_v53 = vpop.permute.xlu0 %1094 }
 0x1a2   : > { %1492 = vmatmul.msk.f32.gmra.mxu2 %vm608_vm1, %v600_v12 }
 0x1a3   : > { %1510 = vmatmul.msk.f32.gmra.mxu3 %vm608_vm1, %v600_v12 }
 0x1a9   : > { %v2034_v58 = vpop.permute.xlu0 %1088 }
 0x1aa   : > { %1493 = vmatmul.msk.f32.gmra.mxu2 %vm608_vm1, %v601_v14 }
 0x1ab   : > { %1511 = vmatmul.msk.f32.gmra.mxu3 %vm608_vm1, %v601_v14 }
 0x1b1   : > { %v2031_v57 = vpop.permute.xlu2 %1180  ;;  %v2040_v0 = vpop.permute.xlu0 %1141 }
 0x1b2   : > { %1494 = vmatmul.msk.f32.gmra.mxu2 %vm608_vm1, %v602_v16 }
 0x1b3   : > { %1512 = vmatmul.msk.f32.gmra.mxu3 %vm608_vm1, %v602_v16 }
 0x1b9   : > { %v2048_v7 = vpop.permute.xlu0 %1135 }
 0x1ba   : > { %1495 = vmatmul.msk.f32.gmra.mxu2 %vm608_vm1, %v603_v19 }
 0x1bb   : > { %1513 = vmatmul.msk.f32.gmra.mxu3 %vm608_vm1, %v603_v19 }
 0x1c2   : > { %1496 = vmatmul.msk.f32.gmra.mxu2 %vm608_vm1, %v604_v22  ;;  %v2064_v17 = vpop.permute.xlu0 %1227 }
 0x1c3   : > { %1514 = vmatmul.msk.f32.gmra.mxu3 %vm608_vm1, %v604_v22 }
 0x1c6   : > { %v2038_v62 = vpop.permute.xlu2 %1233 }
 0x1ca   : > { %1497 = vmatmul.msk.f32.gmra.mxu2 %vm608_vm1, %v605_v25 }
 0x1cb   : > { %1515 = vmatmul.msk.f32.gmra.mxu3 %vm608_vm1, %v605_v25 }
 0x1d2   : > { %1498 = vmatmul.msk.f32.gmra.mxu2 %vm608_vm1, %v606_v26 }
 0x1d3   : > { %1516 = vmatmul.msk.f32.gmra.mxu3 %vm608_vm1, %v606_v26 }
 0x1da   : > { %1499 = vmatmul.msk.f32.gmra.mxu2 %vm608_vm1, %v607_v27 }
 0x1db   : > { %1517 = vmatmul.msk.f32.gmra.mxu3 %vm608_vm1, %v607_v27  ;;  %vm1235_vm1 = vcmask 908288  }
 0x1e7   : > { %v680_v28 = vpop.f32.mrf.mxu0 }
 0x1e8   : > { %v751_v29 = vpop.f32.mrf.mxu1  ;;  %896 = vrot.lane.b32.xlu2 %v680_v28, %s1673_s29  ;;  %v1252_v28 = vld [vmem:[%s2330_s6] sm:$0xff] }
 0x1e9   : > { %898 = vrot.lane.b32.xlu0 %v751_v29, %s1673_s29 }
 0x1ed   : > { %v689_v30 = vpop.f32.mrf.mxu2 }
 0x1ee   : > { %v760_v31 = vpop.f32.mrf.mxu3 }
 0x1ef   : > { %v683_v32 = vpop.f32.mrf.mxu0 }
 0x1f0   : > { %v754_v33 = vpop.f32.mrf.mxu1  ;;  %947 = vrot.lane.b32.xlu2 %v689_v30, %s1674_s14  ;;  %v2079_v30 = vpop.permute.xlu1 %1031 }
 0x1f1   : > { %949 = vrot.lane.b32.xlu0 %v760_v31, %s1674_s14 }
 0x1f5   : > { %v692_v34 = vpop.f32.mrf.mxu2 }
 0x1f6   : > { %v763_v35 = vpop.f32.mrf.mxu3 }
 0x1f7   : > { %v686_v36 = vpop.f32.mrf.mxu0 }
 0x1f8   : > { %902 = vrot.lane.b32.xlu2 %v683_v32, %s1673_s29  ;;  %v757_v37 = vpop.f32.mrf.mxu1 }
 0x1f9   : > { %904 = vrot.lane.b32.xlu0 %v754_v33, %s1673_s29  ;;  %s2343_s29 = smov 112  }
 0x1fd   : > { %v695_v38 = vpop.f32.mrf.mxu2 }
 0x1fe   : > { %v766_v39 = vpop.f32.mrf.mxu3  ;;  %994 = vrot.lane.b32.xlu1 %v695_v38, %s1675_s16 }
 0x200   : > { %988 = vrot.lane.b32.xlu2 %v692_v34, %s1675_s16 }
 0x201   : > { %990 = vrot.lane.b32.xlu0 %v763_v35, %s1675_s16  ;;  %v2091_v35 = vadd.s32 128, %v842_v8 }
 0x203   : > { %vm875_vm14 = vcmp.lt.s32.totalorder %v2091_v35, 240 }
 0x205   : > { %v698_v40 = vpop.f32.mrf.mxu2 }
 0x206   : > { %v769_v41 = vpop.f32.mrf.mxu3 }
 0x208   : > { %941 = vrot.lane.b32.xlu2 %v686_v36, %s1674_s14 }
 0x209   : > { %943 = vrot.lane.b32.xlu0 %v757_v37, %s1674_s14 }
 0x20d   : > { %v701_v42 = vpop.f32.mrf.mxu2 }
 0x20e   : > { %v772_v43 = vpop.f32.mrf.mxu3 }
 0x210   : > { %996 = vrot.lane.b32.xlu2 %v766_v39, %s1675_s16  ;;  %s2348_s16 = smov 111  }
 0x211   : > { %1035 = vrot.lane.b32.xlu0 %v769_v41, %s2342_s26  ;;  %v1269_v41 = vld [vmem:[%s2331_s7 + $0x8] sm:$0xff] }
 0x215   : > { %v2011_v44 = vpop.f32.mrf.mxu2 }
 0x216   : > { %v2013_v45 = vpop.f32.mrf.mxu3 }
 0x218   : > { %1033 = vrot.lane.b32.xlu2 %v698_v40, %s2342_s26 }
 0x219   : > { %1041 = vrot.lane.b32.xlu0 %v772_v43, %s2342_s26  ;;  %v1268_v43 = vld [vmem:[%s2331_s7] sm:$0xff] }
 0x21d   : > { %v2017_v46 = vpop.f32.mrf.mxu2 }
 0x21e   : > { %v2019_v47 = vpop.f32.mrf.mxu3 }
 0x220   : > { %1039 = vrot.lane.b32.xlu2 %v701_v42, %s2342_s26  ;;  %s1546_s26 = smul.u32 96, %s323_s23 }
 0x225   : > { %v710_v51 = vpop.f32.mrf.mxu2 }
 0x226   : > { %v781_v52 = vpop.f32.mrf.mxu3  ;;  %1084 = vrot.lane.b32.xlu1 %v710_v51, %s1677_s21  ;;  %v855_v51 = vand.u32 15, %v2091_v35 }
 0x228   : > { %1086 = vrot.lane.b32.xlu2 %v781_v52, %s1677_s21  ;;  %vm2116_vm10 = vcmp.ge.s32.totalorder %v855_v51, 1  ;;  %vm2124_vm11 = vcmp.le.s32.totalorder %v855_v51, 14 }
 0x229   : > { %vm2156_vm0 = vmand %vm875_vm14, %vm2116_vm10 }
 0x22d   : > { %v713_v55 = vpop.f32.mrf.mxu2 }
 0x22e   : > { %v784_v56 = vpop.f32.mrf.mxu3  ;;  %1090 = vrot.lane.b32.xlu1 %v713_v55, %s1677_s21  ;;  %v2114_v55 = vpop.permute.xlu1 %1261 }
 0x230   : > { %1092 = vrot.lane.b32.xlu2 %v784_v56, %s1677_s21 }
 0x235   : > { %v716_v59 = vpop.f32.mrf.mxu2 }
 0x236   : > { %v787_v61 = vpop.f32.mrf.mxu3  ;;  %1131 = vrot.lane.b32.xlu1 %v716_v59, %s1678_s25 }
 0x238   : > { %1133 = vrot.lane.b32.xlu2 %v787_v61, %s1678_s25 }
 0x23d   : > { %v719_v63 = vpop.f32.mrf.mxu2 }
 0x23e   : > { %v790_v1 = vpop.f32.mrf.mxu3  ;;  %1137 = vrot.lane.b32.xlu1 %v719_v63, %s1678_s25 }
 0x240   : > { %1139 = vrot.lane.b32.xlu2 %v790_v1, %s1678_s25  ;;  %s1628_s25 = scalar_lea.hbm %s2333_s9, 192 }
 0x242   : > { %v2044_v3 = vpop.permute.xlu2 %896 }
 0x243   : > { %v907_v32 = vsel %vm906_vm5, %v895_v60, %v2044_v3 }
 0x244   : > { %v915_v34 = vsel %vm2059_vm6, %v907_v32, 0.0 }
 0x245   : > { %v722_v5 = vpop.f32.mrf.mxu2 }
 0x246   : > { %v793_v6 = vpop.f32.mrf.mxu3  ;;  %1176 = vrot.lane.b32.xlu0 %v722_v5, %s2343_s29 }
 0x247   : > { %1178 = vrot.lane.b32.xlu1 %v793_v6, %s2343_s29 }
 0x24a   : > { %v948_v11 = vpop.permute.xlu2 %947 }
 0x24b   : > { %v954_v16 = vsel %vm951_vm3, %v946_v54, %v948_v11 }
 0x24c   : > { %v962_v21 = vsel %vm872_vm4, %v954_v16, 0.0 }
 0x24d   : > { %v725_v12 = vpop.f32.mrf.mxu2 }
 0x24e   : > { %v796_v14 = vpop.f32.mrf.mxu3  ;;  %1182 = vrot.lane.b32.xlu0 %v725_v12, %s2343_s29 }
 0x24f   : > { %1184 = vrot.lane.b32.xlu1 %v796_v14, %s2343_s29  ;;  %s2194_s29 = scalar_lea.vmem [#allocation3], %s1546_s26 }
 0x250   : > { %s1395_s28 = sshll.u32 %s2194_s29, 4  ;;  %s1396_s28 = int_to_ptr.vmem [resolvable:$true] %s1395_s28 }
 0x252   : > { %v903_v18 = vpop.permute.xlu2 %902 }
 0x253   : > { %v909_v19 = vsel %vm906_vm5, %v901_v49, %v903_v18 }
 0x254   : > { %v917_v22 = vsel %vm2059_vm6, %v909_v19, 0.0 }
 0x255   : > { %v728_v23 = vpop.f32.mrf.mxu2  ;;  %v2072_v24 = vadd.f32 %v962_v21, %v917_v22 }
 0x256   : > { %v799_v25 = vpop.f32.mrf.mxu3 }
 0x257   : > { %1223 = vrot.lane.b32.xlu1 %v728_v23, %s2348_s16  ;;  %1225 = vrot.lane.b32.xlu2 %v799_v25, %s2348_s16 }
 0x25a   : > { %v989_v26 = vpop.permute.xlu2 %988 }
 0x25b   : > { %v899_v27 = vpop.permute.xlu0 %898  ;;  %v999_v38 = vsel %vm998_vm8, %v987_v9, %v989_v26 }
 0x25c   : > { %v1007_v52 = vsel %vm2096_vm9, %v999_v38, 0.0  ;;  %v908_v22 = vsel %vm906_vm5, %v2044_v3, %v899_v27 }
 0x25d   : > { %v731_v29 = vpop.f32.mrf.mxu2 }
 0x25e   : > { %v802_v31 = vpop.f32.mrf.mxu3  ;;  %1229 = vrot.lane.b32.xlu0 %v731_v29, %s2348_s16  ;;  %v916_v29 = vsel %vm2116_vm10, %v908_v22, 0.0 }
 0x25f   : > { %1231 = vrot.lane.b32.xlu1 %v802_v31, %s2348_s16  ;;  %1256 = vperm.xlu2 %1599, %v1252_v28   ;;  %s1547_s16 = smul.u32 96, %s1753_s13  ;;  %s1383_s13 = scalar_lea.sflag [#allocation4], %s323_s23 }
 0x261   : > { %s1394_s24 = scalar_lea.hbm %s2333_s9, %s1547_s16 }
 0x262   : > { %v942_v36 = vpop.permute.xlu2 %941  ;;  %s1397_s22 = sshll.u32 %s1394_s24, 4  ;;  %s1398_s22 = int_to_ptr.hbm [resolvable:$true] %s1397_s22 }
 0x263   : > { %v950_v39 = vpop.permute.xlu0 %949  ;;  %v952_v40 = vsel %vm951_vm3, %v940_v2, %v942_v36  ;;  %s1622_s17 = sshra.s32 %s1398_s22, 4  ;;  %s1623_s17 = int_to_ptr.hbm [resolvable:$true] %s1622_s17 }
 0x264   : > { %v960_v42 = vsel %vm872_vm4, %v952_v40, 0.0  ;;  %v955_v61 = vsel %vm951_vm3, %v948_v11, %v950_v39  ;;  %vm1188_vm4 = vcmask 916480   ;;  %s1624_s26 = scalar_lea.hbm %s1623_s17, 96  ;;  %p1629_p0 = scmp.lt.s32.totalorder %s1623_s17, %s2333_s9 }
 0x265   : > { %v964_v49 = vadd.f32 %v960_v42, %v915_v34  ;;  %p1625_p11 = scmp.ne.s32.totalorder %s1623_s17, %s1624_s26  ;;  %p1630_p1 = scmp.lt.s32.totalorder %s1628_s25, %s1624_s26 }
 0x266   : > { %1277 = vperm.xlu0 %1597, %v1269_v41  }
 0x267   : > { %1272 = vperm.xlu1 %1598, %v1268_v43   ;;  %v2112_v54 = vadd.f32 %v1007_v52, %v964_v49  ;;  %p1626_p12 = pnand %p1625_p11, %p1770_p5  ;;  %p1631_p2 = por %p1630_p1, %p1629_p0 }
 0x269   : > { %p1627_p13 = pneg %p1626_p12 }
 0x26a   : > { %v997_v4 = vpop.permute.xlu2 %996 }
 0x26b   : > { %v905_v59 = vpop.permute.xlu0 %904  ;;  %p1632_p3 = pnand %p1631_p2, %p1627_p13 }
 0x26c   : > { %v910_v60 = vsel %vm906_vm5, %v903_v18, %v905_v59  ;;  %vm2175_vm5 = vmand %vm875_vm14, %vm2124_vm11 }
 0x26d   : > { %v918_v63 = vsel %vm2116_vm10, %v910_v60, 0.0 }
 0x26e   : > { %v967_v1 = vadd.f32 %v955_v61, %v918_v63 }
 0x270   : > { %v995_v5 = vpop.permute.xlu1 %994 }
 0x271   : > { %v1002_v6 = vsel %vm998_vm8, %v995_v5, %v997_v4 }
 0x272   : > { %v1010_v8 = vsel %vm2124_vm11, %v1002_v6, 0.0  ;;  %v1034_v10 = vpop.permute.xlu2 %1033 }
 0x273   : > { %v2131_v9 = vadd.f32 %v1010_v8, %v967_v1  ;;  %v991_v14 = vpop.permute.xlu0 %990  ;;  %v1044_v60 = vsel %vm1043_vm12, %v2079_v30, %v1034_v10 }
 0x274   : > { %v1000_v31 = vsel %vm998_vm8, %v989_v26, %v991_v14  ;;  %v1052_v30 = vsel %vm2050_vm2, %v1044_v60, 0.0 }
 0x275   : > { %v1008_v38 = vsel %vm2124_vm11, %v1000_v31, 0.0  ;;  %v1056_v22 = vadd.f32 %v1052_v30, %v2112_v54 }
 0x27a   : > { %v1040_v12 = vpop.permute.xlu2 %1039 }
 0x27b   : > { %v944_v18 = vpop.permute.xlu0 %943 }
 0x27c   : > { %v953_v23 = vsel %vm951_vm3, %v942_v36, %v944_v18 }
 0x27d   : > { %v965_v32 = vadd.f32 %v953_v23, %v916_v29 }
 0x27f   : > { %v1012_v27 = vadd.f32 %v1008_v38, %v965_v32 }
 0x282   : > { %v1087_v11 = vpop.permute.xlu2 %1086 }
 0x283   : > { %v1036_v25 = vpop.permute.xlu0 %1035  ;;  %v1098_v41 = vsel %vm1096_vm13, %v1087_v11, %v2034_v58 }
 0x284   : > { %v1045_v34 = vsel %vm1043_vm12, %v1034_v10, %v1036_v25  ;;  %v1106_v51 = vsel %vm2124_vm11, %v1098_v41, 0.0  ;;  %v1046_v25 = vsel %vm1043_vm12, %v2067_v20, %v1040_v12 }
 0x285   : > { %v1053_v3 = vsel %vm2116_vm10, %v1045_v34, 0.0 }
 0x286   : > { %v1057_v39 = vadd.f32 %v1053_v3, %v1012_v27 }
 0x288   : > { %v1065_v26 = vadd.f32 %v1057_v39, %v2013_v45 }
 0x28a   : > { %v2133_v16 = vpop.permute.xlu2 %1092  ;;  %v1110_v52 = vadd.f32 %v1106_v51, %v1065_v26 }
 0x28b   : > { %v1042_v49 = vpop.permute.xlu0 %1041 }
 0x28c   : > { %v1047_v18 = vsel %vm1043_vm12, %v1040_v12, %v1042_v49 }
 0x28d   : > { %v1055_v29 = vsel %vm2116_vm10, %v1047_v18, 0.0 }
 0x292   : > { %v1134_v21 = vpop.permute.xlu2 %1133 }
 0x293   : > { %v1145_v43 = vsel %vm1143_vm15, %v1134_v21, %v2048_v7 }
 0x294   : > { %v1153_v45 = vsel %vm2156_vm0, %v1145_v43, 0.0 }
 0x295   : > { %v1157_v61 = vadd.f32 %v1153_v45, %v1110_v52 }
 0x298   : > { %v1085_v15 = vpop.permute.xlu1 %1084 }
 0x29a   : > { %v1140_v36 = vpop.permute.xlu2 %1139 }
 0x2a0   : > { %v2135_v19 = vpop.permute.xlu1 %1090 }
 0x2a8   : > { %v1132_v28 = vpop.permute.xlu1 %1131 }
 0x2a9   : > { %v1144_v31 = vsel %vm1143_vm15, %v1132_v28, %v1134_v21  ;;  %v1099_v28 = vsel %vm1096_vm13, %v2135_v19, %v2133_v16 }
 0x2aa   : > { %v1152_v20 = vsel %vm2050_vm2, %v1144_v31, 0.0  ;;  %v1107_v19 = vsel %vm2085_vm7, %v1099_v28, 0.0 }
 0x2b0   : > { %v1138_v40 = vpop.permute.xlu1 %1137 }
 0x2b1   : > { %v1226_v58 = vpop.permute.xlu2 %1225  ;;  %v1146_v3 = vsel %vm1143_vm15, %v1138_v40, %v1140_v36 }
 0x2b2   : > { %v1237_v63 = vsel %vm1235_vm1, %v1226_v58, %v2064_v17  ;;  %v1001_v17 = vsel %vm998_vm8, %v2021_v48, %v995_v5  ;;  %v1064_v5 = vadd.f32 %v1056_v22, %v2011_v44  ;;  %v1154_v40 = vsel %vm2050_vm2, %v1146_v3, 0.0 }
 0x2b3   : > { %v1245_v8 = vsel %vm2175_vm5, %v1237_v63, 0.0  ;;  %v1009_v48 = vsel %vm2096_vm9, %v1001_v17, 0.0 }
 0x2b4   : > { %v1013_v56 = vadd.f32 %v1009_v48, %v2072_v24  ;;  %v1147_v24 = vsel %vm1143_vm15, %v1140_v36, %v2040_v0 }
 0x2b5   : > { %v1155_v36 = vsel %vm2156_vm0, %v1147_v24, 0.0 }
 0x2b8   : > { %v1177_v10 = vpop.permute.xlu0 %1176 }
 0x2b9   : > { %v1179_v59 = vpop.permute.xlu1 %1178  ;;  %v1257_v63 = vpop.permute.xlu2 %1256 }
 0x2ba   : > { %v1190_v1 = vsel %vm1188_vm4, %v1179_v59, %v2031_v57  ;;  %v1097_v57 = vsel %vm1096_vm13, %v1085_v15, %v1087_v11  ;;  %v1054_v11 = vsel %vm2050_vm2, %v1046_v25, 0.0  ;;  %v1059_v15 = vadd.f32 %v1055_v29, %v2131_v9  ;;  %v1288_v25 = vld [vmem:[%s2332_s8] sm:$0xff]  ;;  %v1291_v29 = vld [vmem:[%s2332_s8 + $0x18] sm:$0xff] }
 0x2bb   : > { %v1198_v4 = vsel %vm875_vm14, %v1190_v1, 0.0  ;;  %v1105_v54 = vsel %vm2085_vm7, %v1097_v57, 0.0  ;;  %v1189_v21 = vsel %vm1188_vm4, %v1177_v10, %v1179_v59  ;;  %v1058_v37 = vadd.f32 %v1054_v11, %v1013_v56  ;;  %v1601_v11 = vld [vmem:[%s1843_s27 + $0x8] sm:$0xff] }
 0x2bc   : > { %v1202_v6 = vadd.f32 %v1198_v4, %v1157_v61  ;;  %v1109_v12 = vadd.f32 %v1105_v54, %v1064_v5  ;;  %v1067_v34 = vadd.f32 %v1059_v15, %v2019_v47  ;;  %v1100_v9 = vsel %vm1096_vm13, %v2133_v16, %v2028_v53  ;;  %v1600_v54 = vld [vmem:[%s1843_s27] sm:$0xff] }
 0x2bd   : > { %v1066_v26 = vadd.f32 %v1058_v37, %v2017_v46  ;;  %v1108_v0 = vsel %vm2124_vm11, %v1100_v9, 0.0  ;;  %v1603_v37 = vld [vmem:[%s1843_s27 + $0x18] sm:$0xff] }
 0x2be   : > { %v1249_v14 = vadd.f32 %v1245_v8, %v1202_v6  ;;  %v1156_v32 = vadd.f32 %v1152_v20, %v1109_v12  ;;  %v1112_v41 = vadd.f32 %v1108_v0, %v1067_v34  ;;  %v1602_v12 = vld [vmem:[%s1843_s27 + $0x10] sm:$0xff]  ;;  %v1604_v34 = vld [vmem:[%s1843_s27 + $0x20] sm:$0xff] }
 0x2bf   : > { %v1111_v43 = vadd.f32 %v1107_v19, %v1066_v26 }
 0x2c0   : > { %1381 = vst [vmem:[%s2194_s29 + $0x58] sm:$0xff] %v1249_v14  ;;  %v1183_v44 = vpop.permute.xlu0 %1182  ;;  %v1201_v27 = vadd.f32 %v1189_v21, %v1156_v32  ;;  %v1159_v49 = vadd.f32 %v1155_v36, %v1112_v41  ;;  %v1265_v6 = vmul.f32 %v1257_v63, %v1249_v14  ;;  %v1290_v14 = vld [vmem:[%s2332_s8 + $0x10] sm:$0xff] }
 0x2c1   : > { %v1185_v23 = vpop.permute.xlu1 %1184  ;;  %v1158_v51 = vadd.f32 %v1154_v40, %v1111_v43 }
 0x2c2   : > { %v1192_v53 = vsel %vm1188_vm4, %v1185_v23, %v2024_v50  ;;  %v1191_v50 = vsel %vm1188_vm4, %v1183_v44, %v1185_v23 }
 0x2c3   : > { %v1200_v46 = vsel %vm875_vm14, %v1192_v53, 0.0  ;;  %v1203_v42 = vadd.f32 %v1191_v50, %v1158_v51 }
 0x2c9   : > { %v1224_v38 = vpop.permute.xlu1 %1223 }
 0x2ca   : > { %v1236_v39 = vsel %vm1235_vm1, %v1224_v38, %v1226_v58  ;;  %v1204_v58 = vadd.f32 %v1200_v46, %v1159_v49  ;;  %v1605_v38 = vld [vmem:[%s1843_s27 + $0x28] sm:$0xff] }
 0x2cb   : > { %v1244_v47 = vsel %vm2085_vm7, %v1236_v39, 0.0  ;;  %v1606_v39 = vld [vmem:[%s1843_s27 + $0x30] sm:$0xff] }
 0x2cc   : > { %v1248_v16 = vadd.f32 %v1244_v47, %v1201_v27  ;;  %v1607_v47 = vld [vmem:[%s1843_s27 + $0x38] sm:$0xff] }
 0x2ce   : > { %1380 = vst [vmem:[%s2194_s29 + $0x50] sm:$0xff] %v1248_v16  ;;  %v1264_v30 = vmul.f32 %v1257_v63, %v1248_v16 }
 0x2d0   : > { %v1230_v2 = vpop.permute.xlu0 %1229 }
 0x2d1   : > { %v1232_v45 = vpop.permute.xlu1 %1231 }
 0x2d2   : > { %v1239_v13 = vsel %vm1235_vm1, %v1232_v45, %v2038_v62  ;;  %v1238_v52 = vsel %vm1235_vm1, %v1230_v2, %v1232_v45 }
 0x2d3   : > { %v1247_v59 = vsel %vm2175_vm5, %v1239_v13, 0.0  ;;  %v1246_v35 = vsel %vm2085_vm7, %v1238_v52, 0.0 }
 0x2d4   : > { %v1251_v60 = vadd.f32 %v1247_v59, %v1204_v58  ;;  %v1250_v61 = vadd.f32 %v1246_v35, %v1203_v42 }
 0x2d6   : > { %1375 = vst [vmem:[%s2194_s29 + $0x28] sm:$0xff] %v1251_v60  ;;  %v1266_v1 = vmul.f32 %v2114_v55, %v1250_v61  ;;  %v1267_v4 = vmul.f32 %v2114_v55, %v1251_v60  ;;  %v1289_v55 = vld [vmem:[%s2332_s8 + $0x8] sm:$0xff] }
 0x2d7   : > { %1374 = vst [vmem:[%s2194_s29 + $0x20] sm:$0xff] %v1250_v61 }
 0x2d8   : > { %v1278_v62 = vpop.permute.xlu0 %1277 }
 0x2d9   : > { %v1273_v8 = vpop.permute.xlu1 %1272  ;;  %v1282_v10 = vadd.f32 %v1278_v62, %v1266_v1  ;;  %v1283_v18 = vadd.f32 %v1278_v62, %v1267_v4 }
 0x2da   : > { %v1280_v7 = vadd.f32 %v1273_v8, %v1264_v30  ;;  %v1281_v17 = vadd.f32 %v1273_v8, %v1265_v6 }
 0x2db   : > { %v1286_v22 = vmax.f32 %v1282_v10, 0.0  ;;  %v1287_v33 = vmax.f32 %v1283_v18, 0.0 }
 0x2dc   : > { %v1284_v57 = vmax.f32 %v1280_v7, 0.0  ;;  %v1285_v23 = vmax.f32 %v1281_v17, 0.0 }
 0x2dd   : > { %1318 = vmatpush.msra.mxu0 %v1286_v22  ;;  %1347 = vmatpush.msra.mxu1 %v1287_v33 }
 0x2df   : > { %1319 = vmatpush.msra.mxu0 %v1284_v57  ;;  %1348 = vmatpush.msra.mxu1 %v1285_v23 }
 0x2e0   : > { %1518 = vmatmul.msk.f32.vlgmr.msra.gmra.mxu0 %vm951_vm3, %v1288_v25  ;;  %1522 = vmatmul.msk.f32.vlgmr.msra.gmra.mxu1 %vm951_vm3, %v1288_v25 }
 0x2e8   : > { %1519 = vmatmul.msk.f32.gmra.mxu0 %vm951_vm3, %v1289_v55  ;;  %1523 = vmatmul.msk.f32.gmra.mxu1 %vm951_vm3, %v1289_v55 }
 0x2f0   : > { %1520 = vmatmul.msk.f32.gmra.mxu0 %vm951_vm3, %v1290_v14  ;;  %1524 = vmatmul.msk.f32.gmra.mxu1 %vm951_vm3, %v1290_v14 }
 0x2f8   : > { %1521 = vmatmul.msk.f32.gmra.mxu0 %vm951_vm3, %v1291_v29  ;;  %1525 = vmatmul.msk.f32.gmra.mxu1 %vm951_vm3, %v1291_v29 }
 0x35d   : > { %v1321_v31 = vpop.f32.mrf.mxu0  ;;  %v1350_v48 = vpop.f32.mrf.mxu1 }
 0x35e   : > { %v1362_v5 = vadd.f32 %v1600_v54, %v1321_v31  ;;  %v1363_v15 = vadd.f32 %v1601_v11, %v1350_v48 }
 0x360   : > { %1370 = vst [vmem:[%s2194_s29] sm:$0xff] %v1362_v5 }
 0x361   : > { %1371 = vst [vmem:[%s2194_s29 + $0x8] sm:$0xff] %v1363_v15 }
 0x365   : > { %v1324_v20 = vpop.f32.mrf.mxu0  ;;  %v1353_v56 = vpop.f32.mrf.mxu1 }
 0x366   : > { %v1364_v21 = vadd.f32 %v1602_v12, %v1324_v20  ;;  %v1365_v28 = vadd.f32 %v1603_v37, %v1353_v56 }
 0x368   : > { %1372 = vst [vmem:[%s2194_s29 + $0x10] sm:$0xff] %v1364_v21 }
 0x369   : > { %1373 = vst [vmem:[%s2194_s29 + $0x18] sm:$0xff] %v1365_v28 }
 0x36d   : > { %v1327_v32 = vpop.f32.mrf.mxu0  ;;  %v1356_v44 = vpop.f32.mrf.mxu1 }
 0x36e   : > { %v1366_v9 = vadd.f32 %v1604_v34, %v1327_v32  ;;  %v1367_v24 = vadd.f32 %v1605_v38, %v1356_v44 }
 0x370   : > { %1376 = vst [vmem:[%s2194_s29 + $0x30] sm:$0xff] %v1366_v9 }
 0x371   : > { %1377 = vst [vmem:[%s2194_s29 + $0x38] sm:$0xff] %v1367_v24 }
 0x375   : > { %v1330_v3 = vpop.f32.mrf.mxu0  ;;  %v1359_v27 = vpop.f32.mrf.mxu1 }
 0x376   : > { %v1368_v19 = vadd.f32 %v1606_v39, %v1330_v3  ;;  %v1369_v26 = vadd.f32 %v1607_v47, %v1359_v27 }
 0x378   : > { %1378 = vst [vmem:[%s2194_s29 + $0x40] sm:$0xff] %v1368_v19 }
 0x379   : > { %1379 = vst [vmem:[%s2194_s29 + $0x48] sm:$0xff] %v1369_v26 }
 0x37a   : > { %1635 = shalt.err (!%p1632_p3)
}
 0x37b   : > { %s1681_s23 = smov 256  }
 0x37c   : > { %1548 = dma.vmem_to_hbm [thread:$0]  (%p1770_p5), %s1396_s28, 1536, %s1398_s22, %s1383_s13, %s1681_s23, %s1681_s23, %s1674_s14  }
 0x37d PF: > { %p1554_p4 = scmp.ge.s32.totalorder %s1670_s12, 2  ;;  %s1412_s29 = sand.u32 1, %s1658_s30  }
 0x37e   : > { %s1413_s16 = scalar_lea.sflag [#allocation4], %s1412_s29 }
 0x37f   : > { %p1551_p7 = pnand %p1554_p4, %p1774_p6 }
 0x381   : > { %p1552_p8 = pneg %p1551_p7 }
 0x383   : > { %1653 = dma.done.wait (%p1552_p8), %s1413_s16, 1536  }
 0x384   : > { %1655 = vsyncadd (%p1552_p8), %s1413_s16, 4294965760  ;;  %p19_p9 = scmp.ge.s32.totalorder %s1757_s15, 4   ;;  %s2361_s30 = smov %s1662_s10 }
 0x385   : > { %s2362_s10 = smov %s1666_s11  ;;  %s2363_s11 = smov %s1768_s18 }
 0x386   : > { %s2364_s12 = smov %s1757_s15  ;;  %21 = sbr.rel (!%p19_p9) target bundleno = 3 (0x3), region = 91 }
 0x38b   :  { %1419 = vsyncpa [#allocation4], 1 }
 0x38c   :  { %1421 = vsyncpa [#allocation4 + $0x1], 1 }

</bundles_post_ra>
